<compile_context>
chip_gen: v5e
topology: v5e:2x2
jax: 0.10.0
libtpu: 0.0.40
codegen_flags: <defaults>
</compile_context>

<pallas_src>
import jax
import jax.numpy as jnp
from jax.experimental import pallas as pl
from jax.experimental.pallas import tpu as pltpu

# ---------------- small synthetic ViT config ----------------
B = 2            # batch
C = 4            # input channels
H = W = 32       # image size
P = 16           # patch size (conv kernel == stride == 16)
D = 32           # hidden dim
NH = 4           # attention heads
HD = D // NH     # head dim
MLP = 4 * D      # mlp hidden dim
DEPTH = 2        # number of transformer blocks
NP = (H // P) * (W // P)   # num patches
S = NP + 1                 # sequence length incl. cls token
BS = B * S                 # flattened token count
CPP = C * P * P            # patch-row width
LN_EPS = 1e-6
BN_EPS = 1e-5
SCALE = 1.0 / (HD ** 0.5)


# ---------------- in-kernel helpers (f32 elementwise math) ----------------
def _layernorm(x, g, b):
    mu = jnp.mean(x, axis=-1, keepdims=True)
    var = jnp.mean((x - mu) ** 2, axis=-1, keepdims=True)
    return (x - mu) * jax.lax.rsqrt(var + LN_EPS) * g + b


def _gelu(x):
    # tanh-approximate GELU (EUP friendly)
    return 0.5 * x * (1.0 + jnp.tanh(0.7978845608028654 * (x + 0.044715 * x * x * x)))


# ---------------- fused ViT kernel ----------------
def vit_fused_kernel(
    # constants across depth
    patches_ref, wpatch_ref, bpatch_ref, clspos_ref, posrest_ref, bias_ref,
    # per-depth block weights (selected by the depth grid axis)
    ln1g_ref, ln1b_ref, wq_ref, wk_ref, wv_ref, bq_ref, bk_ref, bv_ref,
    wproj_ref, bproj_ref, ln2g_ref, ln2b_ref,
    wfc1_ref, bfc1_ref, wfc2_ref, bfc2_ref,
    # head constants (final LN affine pre-fused with eval BatchNorm1d)
    headg_ref, headb_ref,
    # output + VMEM-resident residual stream
    out_ref, x_ref,
):
    d = pl.program_id(0)

    # ---- prologue (d == 0): patch embed + cls token + pos embed ----
    @pl.when(d == 0)
    def _():
        emb = jnp.dot(patches_ref[...], wpatch_ref[...],
                      preferred_element_type=jnp.float32) + bpatch_ref[...]   # (B*NP, D)
        rows = []
        for b in range(B):  # B is tiny; static unroll, single store below
            rows.append(clspos_ref[...])
            rows.append(emb[b * NP:(b + 1) * NP, :] + posrest_ref[...])
        x_ref[...] = jnp.concatenate(rows, axis=0)            # one (BS, D) VMEM store
        # pos_drop: identity at inference

    x = x_ref[...]                                            # (BS, D) f32

    # ---- multi-head self-attention ----
    h1 = _layernorm(x, ln1g_ref[...], ln1b_ref[...]).astype(jnp.bfloat16)
    q = jnp.dot(h1, wq_ref[...], preferred_element_type=jnp.float32) + bq_ref[...]
    k = jnp.dot(h1, wk_ref[...], preferred_element_type=jnp.float32) + bk_ref[...]
    v = jnp.dot(h1, wv_ref[...], preferred_element_type=jnp.float32) + bv_ref[...]
    q = q * SCALE                       # fold 1/sqrt(HD) into q

    def heads(t):                       # (BS, D) -> (NH, BS, HD), heads batched
        return jnp.stack([t[:, h * HD:(h + 1) * HD] for h in range(NH)],
                         axis=0).astype(jnp.bfloat16)

    qh, kh, vh = heads(q), heads(k), heads(v)

    s = jnp.einsum('hqd,hkd->hqk', qh, kh,
                   preferred_element_type=jnp.float32)        # (NH, BS, BS)
    s = s + bias_ref[...]               # block-diagonal bias: no cross-image attention
    s = s - jnp.max(s, axis=-1, keepdims=True)
    p = jnp.exp(s)
    p = p * pl.reciprocal(jnp.sum(p, axis=-1, keepdims=True), approx=True)
    o = jnp.einsum('hqk,hkd->hqd', p.astype(jnp.bfloat16), vh,
                   preferred_element_type=jnp.float32)        # (NH, BS, HD)

    attn = jnp.concatenate([o[h] for h in range(NH)], axis=-1)   # (BS, D)
    x = x + (jnp.dot(attn.astype(jnp.bfloat16), wproj_ref[...],
                     preferred_element_type=jnp.float32) + bproj_ref[...])

    # ---- MLP ----
    h2 = _layernorm(x, ln2g_ref[...], ln2b_ref[...]).astype(jnp.bfloat16)
    m = jnp.dot(h2, wfc1_ref[...], preferred_element_type=jnp.float32) + bfc1_ref[...]
    m = _gelu(m).astype(jnp.bfloat16)
    m = jnp.dot(m, wfc2_ref[...], preferred_element_type=jnp.float32) + bfc2_ref[...]
    x = x + m

    x_ref[...] = x                      # residual stream stays VMEM-resident

    # ---- epilogue (d == last): final LN (fused with eval BN) on cls rows ----
    @pl.when(d == DEPTH - 1)
    def _():
        cls = jnp.concatenate([x[b * S:b * S + 1, :] for b in range(B)], axis=0)  # (B, D)
        out_ref[...] = _layernorm(cls, headg_ref[...], headb_ref[...])


# ---------------- BlockSpec helpers ----------------
def _const_spec(shape):
    n = len(shape)
    return pl.BlockSpec(shape, lambda d, n=n: (0,) * n)


def _depth_spec(shape):
    # leading depth axis squeezed out; grid step d selects block d's weights
    n = len(shape)
    return pl.BlockSpec((None,) + tuple(shape), lambda d, n=n: (d,) + (0,) * n)


# ---------------- parameter init (deterministic, synthetic) ----------------
def init_params(key):
    keys = iter(jax.random.split(key, 40))

    def nrm(shape, s=0.02):
        return (s * jax.random.normal(next(keys), shape)).astype(jnp.float32)

    p = {}
    conv_w = nrm((D, C, P, P))                                # Conv2d weight
    p['wpatch'] = conv_w.reshape(D, CPP).T.astype(jnp.bfloat16)   # (CPP, D) bf16
    p['bpatch'] = nrm((1, D))
    cls_token = nrm((1, D))
    pos_embed = nrm((S, D))
    p['clspos'] = cls_token + pos_embed[0:1, :]               # (1, D)
    p['posrest'] = pos_embed[1:, :]                           # (NP, D)

    p['ln1g'] = jnp.ones((DEPTH, 1, D), jnp.float32)
    p['ln1b'] = jnp.zeros((DEPTH, 1, D), jnp.float32)
    p['wq'] = nrm((DEPTH, D, D)).astype(jnp.bfloat16)
    p['wk'] = nrm((DEPTH, D, D)).astype(jnp.bfloat16)
    p['wv'] = nrm((DEPTH, D, D)).astype(jnp.bfloat16)
    p['bq'] = nrm((DEPTH, 1, D))
    p['bk'] = nrm((DEPTH, 1, D))
    p['bv'] = nrm((DEPTH, 1, D))
    p['wproj'] = nrm((DEPTH, D, D)).astype(jnp.bfloat16)
    p['bproj'] = nrm((DEPTH, 1, D))
    p['ln2g'] = jnp.ones((DEPTH, 1, D), jnp.float32)
    p['ln2b'] = jnp.zeros((DEPTH, 1, D), jnp.float32)
    p['wfc1'] = nrm((DEPTH, D, MLP)).astype(jnp.bfloat16)
    p['bfc1'] = nrm((DEPTH, 1, MLP))
    p['wfc2'] = nrm((DEPTH, MLP, D)).astype(jnp.bfloat16)
    p['bfc2'] = nrm((DEPTH, 1, D))

    # final LayerNorm affine
    normg = jnp.ones((1, D), jnp.float32)
    normb = jnp.zeros((1, D), jnp.float32)
    # BatchNorm1d (eval): init.normal_(weight, 1.0, 0.02), bias = 0, running stats
    bn_w = (1.0 + 0.02 * jax.random.normal(next(keys), (1, D))).astype(jnp.float32)
    bn_b = jnp.zeros((1, D), jnp.float32)
    running_mean = jnp.zeros((1, D), jnp.float32)
    running_var = jnp.ones((1, D), jnp.float32)
    bn_scale = bn_w * jax.lax.rsqrt(running_var + BN_EPS)
    bn_shift = bn_b - running_mean * bn_scale
    # fuse LN affine with eval BN affine (both per-channel affine maps):
    #   (xhat*g + b)*s + t == xhat*(g*s) + (b*s + t)
    p['headg'] = normg * bn_scale
    p['headb'] = normb * bn_scale + bn_shift
    return p


# ---------------- full forward (one fused pallas_call) ----------------
def vit_forward(x_nchw, params):
    b, c, h, w = x_nchw.shape
    assert (b, c, h, w) == (B, C, H, W)
    hp, wp = h // P, w // P

    # unfold NCHW into patch rows; (c, ph, pw) order matches Conv2d weight flatten
    patches = (x_nchw.reshape(b, c, hp, P, wp, P)
               .transpose(0, 2, 4, 1, 3, 5)
               .reshape(b * hp * wp, CPP)
               .astype(jnp.bfloat16))

    # block-diagonal additive bias: tokens attend only within their own image
    batch_ids = jnp.repeat(jnp.arange(B), S)
    attn_bias = jnp.where(batch_ids[:, None] == batch_ids[None, :],
                          0.0, -1e30).astype(jnp.float32)[None]    # (1, BS, BS)

    inputs = (
        patches, params['wpatch'], params['bpatch'],
        params['clspos'], params['posrest'], attn_bias,
        params['ln1g'], params['ln1b'],
        params['wq'], params['wk'], params['wv'],
        params['bq'], params['bk'], params['bv'],
        params['wproj'], params['bproj'],
        params['ln2g'], params['ln2b'],
        params['wfc1'], params['bfc1'],
        params['wfc2'], params['bfc2'],
        params['headg'], params['headb'],
    )

    in_specs = [
        _const_spec((B * NP, CPP)),     # patches
        _const_spec((CPP, D)),          # wpatch
        _const_spec((1, D)),            # bpatch
        _const_spec((1, D)),            # clspos
        _const_spec((NP, D)),           # posrest
        _const_spec((1, BS, BS)),       # attn bias
        _depth_spec((1, D)),            # ln1 gamma
        _depth_spec((1, D)),            # ln1 beta
        _depth_spec((D, D)),            # wq
        _depth_spec((D, D)),            # wk
        _depth_spec((D, D)),            # wv
        _depth_spec((1, D)),            # bq
        _depth_spec((1, D)),            # bk
        _depth_spec((1, D)),            # bv
        _depth_spec((D, D)),            # wproj
        _depth_spec((1, D)),            # bproj
        _depth_spec((1, D)),            # ln2 gamma
        _depth_spec((1, D)),            # ln2 beta
        _depth_spec((D, MLP)),          # wfc1
        _depth_spec((1, MLP)),          # bfc1
        _depth_spec((MLP, D)),          # wfc2
        _depth_spec((1, D)),            # bfc2
        _const_spec((1, D)),            # head gamma (LN * BN fused)
        _const_spec((1, D)),            # head beta  (LN * BN fused)
    ]

    return pl.pallas_call(
        vit_fused_kernel,
        out_shape=jax.ShapeDtypeStruct((B, D), jnp.float32),
        grid_spec=pltpu.PrefetchScalarGridSpec(
            num_scalar_prefetch=0,
            grid=(DEPTH,),
            in_specs=in_specs,
            out_specs=pl.BlockSpec((B, D), lambda d: (0, 0)),
            scratch_shapes=[pltpu.VMEM((BS, D), jnp.float32)],
        ),
        compiler_params=pltpu.CompilerParams(
            # depth carries the residual stream -> sequential
            dimension_semantics=("arbitrary",)),
    )(*inputs)


if __name__ == "__main__":
    key = jax.random.PRNGKey(0)
    k_in, k_par = jax.random.split(key)
    x = jax.random.normal(k_in, (B, C, H, W), dtype=jnp.float32)
    params = init_params(k_par)

    out = jax.jit(vit_forward)(x, params)
    out = jax.block_until_ready(out)
    assert out.shape == (B, D) and out.dtype == jnp.float32
    print("KERNEL_OK")
</pallas_src>

<mosaic_0001>
module attributes {stable_mosaic.version = 11 : i64} {
  func.func @vit_fused_kernel(%arg0: i32, %arg1: memref<8x1024xbf16, #tpu.memory_space<vmem>>, %arg2: memref<1024x32xbf16, #tpu.memory_space<vmem>>, %arg3: memref<1x32xf32, #tpu.memory_space<vmem>>, %arg4: memref<1x32xf32, #tpu.memory_space<vmem>>, %arg5: memref<4x32xf32, #tpu.memory_space<vmem>>, %arg6: memref<1x10x10xf32, #tpu.memory_space<vmem>>, %arg7: memref<1x1x32xf32, #tpu.memory_space<vmem>>, %arg8: memref<1x1x32xf32, #tpu.memory_space<vmem>>, %arg9: memref<1x32x32xbf16, #tpu.memory_space<vmem>>, %arg10: memref<1x32x32xbf16, #tpu.memory_space<vmem>>, %arg11: memref<1x32x32xbf16, #tpu.memory_space<vmem>>, %arg12: memref<1x1x32xf32, #tpu.memory_space<vmem>>, %arg13: memref<1x1x32xf32, #tpu.memory_space<vmem>>, %arg14: memref<1x1x32xf32, #tpu.memory_space<vmem>>, %arg15: memref<1x32x32xbf16, #tpu.memory_space<vmem>>, %arg16: memref<1x1x32xf32, #tpu.memory_space<vmem>>, %arg17: memref<1x1x32xf32, #tpu.memory_space<vmem>>, %arg18: memref<1x1x32xf32, #tpu.memory_space<vmem>>, %arg19: memref<1x32x128xbf16, #tpu.memory_space<vmem>>, %arg20: memref<1x1x128xf32, #tpu.memory_space<vmem>>, %arg21: memref<1x128x32xbf16, #tpu.memory_space<vmem>>, %arg22: memref<1x1x32xf32, #tpu.memory_space<vmem>>, %arg23: memref<1x32xf32, #tpu.memory_space<vmem>>, %arg24: memref<1x32xf32, #tpu.memory_space<vmem>>, %arg25: memref<2x32xf32, #tpu.memory_space<vmem>>, %arg26: memref<10x32xf32, #tpu.memory_space<vmem>>) attributes {dimension_semantics = [#tpu.dimension_semantics<arbitrary>], iteration_bounds = array<i64: 2>, scalar_prefetch = 0 : i64, scratch_operands = 1 : i64, tpu.core_type = #tpu.core_type<tc>, window_params = [{pipeline_mode = #tpu.pipeline_mode<synchronous>, transform_indices = @transform_0, window_bounds = array<i64: 8, 1024>}, {pipeline_mode = #tpu.pipeline_mode<synchronous>, transform_indices = @transform_1, window_bounds = array<i64: 1024, 32>}, {pipeline_mode = #tpu.pipeline_mode<synchronous>, transform_indices = @transform_2, window_bounds = array<i64: 1, 32>}, {pipeline_mode = #tpu.pipeline_mode<synchronous>, transform_indices = @transform_3, window_bounds = array<i64: 1, 32>}, {pipeline_mode = #tpu.pipeline_mode<synchronous>, transform_indices = @transform_4, window_bounds = array<i64: 4, 32>}, {pipeline_mode = #tpu.pipeline_mode<synchronous>, transform_indices = @transform_5, window_bounds = array<i64: 1, 10, 10>}, {transform_indices = @transform_6, window_bounds = array<i64: 1, 1, 32>}, {transform_indices = @transform_7, window_bounds = array<i64: 1, 1, 32>}, {transform_indices = @transform_8, window_bounds = array<i64: 1, 32, 32>}, {transform_indices = @transform_9, window_bounds = array<i64: 1, 32, 32>}, {transform_indices = @transform_10, window_bounds = array<i64: 1, 32, 32>}, {transform_indices = @transform_11, window_bounds = array<i64: 1, 1, 32>}, {transform_indices = @transform_12, window_bounds = array<i64: 1, 1, 32>}, {transform_indices = @transform_13, window_bounds = array<i64: 1, 1, 32>}, {transform_indices = @transform_14, window_bounds = array<i64: 1, 32, 32>}, {transform_indices = @transform_15, window_bounds = array<i64: 1, 1, 32>}, {transform_indices = @transform_16, window_bounds = array<i64: 1, 1, 32>}, {transform_indices = @transform_17, window_bounds = array<i64: 1, 1, 32>}, {transform_indices = @transform_18, window_bounds = array<i64: 1, 32, 128>}, {transform_indices = @transform_19, window_bounds = array<i64: 1, 1, 128>}, {transform_indices = @transform_20, window_bounds = array<i64: 1, 128, 32>}, {transform_indices = @transform_21, window_bounds = array<i64: 1, 1, 32>}, {pipeline_mode = #tpu.pipeline_mode<synchronous>, transform_indices = @transform_22, window_bounds = array<i64: 1, 32>}, {pipeline_mode = #tpu.pipeline_mode<synchronous>, transform_indices = @transform_23, window_bounds = array<i64: 1, 32>}, {pipeline_mode = #tpu.pipeline_mode<synchronous>, transform_indices = @transform_24, window_bounds = array<i64: 2, 32>}]} {
    %c0_i32 = arith.constant 0 : i32
    %0 = arith.cmpi eq, %arg0, %c0_i32 : i32
    %1 = arith.extui %0 : i1 to i32
    %c0_i32_0 = arith.constant 0 : i32
    %2 = arith.cmpi ne, %1, %c0_i32_0 : i32
    scf.if %2 {
      %c0_80 = arith.constant 0 : index
      %c0_81 = arith.constant 0 : index
      %178 = vector.load %arg1[%c0_80, %c0_81] : memref<8x1024xbf16, #tpu.memory_space<vmem>>, vector<8x1024xbf16>
      %c0_82 = arith.constant 0 : index
      %c0_83 = arith.constant 0 : index
      %179 = vector.load %arg2[%c0_82, %c0_83] : memref<1024x32xbf16, #tpu.memory_space<vmem>>, vector<1024x32xbf16>
      %cst_84 = arith.constant dense<0.000000e+00> : vector<8x32xf32>
      %180 = tpu.matmul %178, %179, %cst_84 {dimension_numbers = #tpu.dot_dimension_numbers<[1], [0], [0], [1], [0, 0, 1, 1], [], []>} : vector<8x1024xbf16>, vector<1024x32xbf16>, vector<8x32xf32> -> vector<8x32xf32>
      %c0_85 = arith.constant 0 : index
      %c0_86 = arith.constant 0 : index
      %181 = vector.load %arg3[%c0_85, %c0_86] : memref<1x32xf32, #tpu.memory_space<vmem>>, vector<1x32xf32>
      %182 = vector.broadcast %181 : vector<1x32xf32> to vector<8x32xf32>
      %183 = arith.addf %180, %182 : vector<8x32xf32>
      %c0_87 = arith.constant 0 : index
      %c0_88 = arith.constant 0 : index
      %184 = vector.load %arg4[%c0_87, %c0_88] : memref<1x32xf32, #tpu.memory_space<vmem>>, vector<1x32xf32>
      %185 = vector.extract_strided_slice %183 {offsets = [0, 0], sizes = [4, 32], strides = [1, 1]} : vector<8x32xf32> to vector<4x32xf32>
      %c0_89 = arith.constant 0 : index
      %c0_90 = arith.constant 0 : index
      %186 = vector.load %arg5[%c0_89, %c0_90] : memref<4x32xf32, #tpu.memory_space<vmem>>, vector<4x32xf32>
      %187 = arith.addf %185, %186 : vector<4x32xf32>
      %c0_91 = arith.constant 0 : index
      %c0_92 = arith.constant 0 : index
      %188 = vector.load %arg4[%c0_91, %c0_92] : memref<1x32xf32, #tpu.memory_space<vmem>>, vector<1x32xf32>
      %189 = vector.extract_strided_slice %183 {offsets = [4, 0], sizes = [4, 32], strides = [1, 1]} : vector<8x32xf32> to vector<4x32xf32>
      %c0_93 = arith.constant 0 : index
      %c0_94 = arith.constant 0 : index
      %190 = vector.load %arg5[%c0_93, %c0_94] : memref<4x32xf32, #tpu.memory_space<vmem>>, vector<4x32xf32>
      %191 = arith.addf %189, %190 : vector<4x32xf32>
      %192 = tpu.concatenate %184, %187, %188, %191 in 0 : vector<1x32xf32>, vector<4x32xf32>, vector<1x32xf32>, vector<4x32xf32> -> vector<10x32xf32>
      %c0_95 = arith.constant 0 : index
      %c0_96 = arith.constant 0 : index
      %193 = vector.load %arg26[%c0_95, %c0_96] : memref<10x32xf32, #tpu.memory_space<vmem>>, vector<10x32xf32>
      tpu.vector_store %arg26[%c0_95, %c0_96], %192 {strides = array<i32>} : memref<10x32xf32, #tpu.memory_space<vmem>>, vector<10x32xf32>,
    } else {
    }
    %c0 = arith.constant 0 : index
    %c0_1 = arith.constant 0 : index
    %3 = vector.load %arg26[%c0, %c0_1] : memref<10x32xf32, #tpu.memory_space<vmem>>, vector<10x32xf32>
    %c0_2 = arith.constant 0 : index
    %c0_3 = arith.constant 0 : index
    %c0_4 = arith.constant 0 : index
    %4 = vector.load %arg7[%c0_2, %c0_3, %c0_4] : memref<1x1x32xf32, #tpu.memory_space<vmem>>, vector<1x1x32xf32>
    %5 = vector.shape_cast %4 : vector<1x1x32xf32> to vector<1x32xf32>
    %c0_5 = arith.constant 0 : index
    %c0_6 = arith.constant 0 : index
    %c0_7 = arith.constant 0 : index
    %6 = vector.load %arg8[%c0_5, %c0_6, %c0_7] : memref<1x1x32xf32, #tpu.memory_space<vmem>>, vector<1x1x32xf32>
    %7 = vector.shape_cast %6 : vector<1x1x32xf32> to vector<1x32xf32>
    %cst = arith.constant dense<0.000000e+00> : vector<10xf32>
    %8 = vector.multi_reduction <add>, %3, %cst [1] : vector<10x32xf32> to vector<10xf32>
    %9 = vector.shape_cast %8 : vector<10xf32> to vector<10x1xf32>
    %cst_8 = arith.constant 3.200000e+01 : f32
    %10 = vector.broadcast %cst_8 : f32 to vector<10x1xf32>
    %11 = arith.divf %9, %10 : vector<10x1xf32>
    %12 = vector.broadcast %11 : vector<10x1xf32> to vector<10x32xf32>
    %13 = arith.subf %3, %12 : vector<10x32xf32>
    %14 = arith.mulf %13, %13 : vector<10x32xf32>
    %cst_9 = arith.constant dense<0.000000e+00> : vector<10xf32>
    %15 = vector.multi_reduction <add>, %14, %cst_9 [1] : vector<10x32xf32> to vector<10xf32>
    %16 = vector.shape_cast %15 : vector<10xf32> to vector<10x1xf32>
    %cst_10 = arith.constant 3.200000e+01 : f32
    %17 = vector.broadcast %cst_10 : f32 to vector<10x1xf32>
    %18 = arith.divf %16, %17 : vector<10x1xf32>
    %19 = vector.broadcast %11 : vector<10x1xf32> to vector<10x32xf32>
    %20 = arith.subf %3, %19 : vector<10x32xf32>
    %cst_11 = arith.constant 9.99999997E-7 : f32
    %21 = vector.broadcast %cst_11 : f32 to vector<10x1xf32>
    %22 = arith.addf %18, %21 : vector<10x1xf32>
    %23 = math.rsqrt %22 : vector<10x1xf32>
    %24 = vector.broadcast %23 : vector<10x1xf32> to vector<10x32xf32>
    %25 = arith.mulf %20, %24 : vector<10x32xf32>
    %26 = vector.broadcast %5 : vector<1x32xf32> to vector<10x32xf32>
    %27 = arith.mulf %25, %26 : vector<10x32xf32>
    %28 = vector.broadcast %7 : vector<1x32xf32> to vector<10x32xf32>
    %29 = arith.addf %27, %28 : vector<10x32xf32>
    %30 = arith.truncf %29 : vector<10x32xf32> to vector<10x32xbf16>
    %c0_12 = arith.constant 0 : index
    %c0_13 = arith.constant 0 : index
    %c0_14 = arith.constant 0 : index
    %31 = vector.load %arg9[%c0_12, %c0_13, %c0_14] : memref<1x32x32xbf16, #tpu.memory_space<vmem>>, vector<1x32x32xbf16>
    %32 = vector.shape_cast %31 : vector<1x32x32xbf16> to vector<32x32xbf16>
    %cst_15 = arith.constant dense<0.000000e+00> : vector<10x32xf32>
    %33 = tpu.matmul %30, %32, %cst_15 {dimension_numbers = #tpu.dot_dimension_numbers<[1], [0], [0], [1], [0, 0, 1, 1], [], []>} : vector<10x32xbf16>, vector<32x32xbf16>, vector<10x32xf32> -> vector<10x32xf32>
    %c0_16 = arith.constant 0 : index
    %c0_17 = arith.constant 0 : index
    %c0_18 = arith.constant 0 : index
    %34 = vector.load %arg12[%c0_16, %c0_17, %c0_18] : memref<1x1x32xf32, #tpu.memory_space<vmem>>, vector<1x1x32xf32>
    %35 = vector.shape_cast %34 : vector<1x1x32xf32> to vector<1x32xf32>
    %36 = vector.broadcast %35 : vector<1x32xf32> to vector<10x32xf32>
    %37 = arith.addf %33, %36 : vector<10x32xf32>
    %c0_19 = arith.constant 0 : index
    %c0_20 = arith.constant 0 : index
    %c0_21 = arith.constant 0 : index
    %38 = vector.load %arg10[%c0_19, %c0_20, %c0_21] : memref<1x32x32xbf16, #tpu.memory_space<vmem>>, vector<1x32x32xbf16>
    %39 = vector.shape_cast %38 : vector<1x32x32xbf16> to vector<32x32xbf16>
    %cst_22 = arith.constant dense<0.000000e+00> : vector<10x32xf32>
    %40 = tpu.matmul %30, %39, %cst_22 {dimension_numbers = #tpu.dot_dimension_numbers<[1], [0], [0], [1], [0, 0, 1, 1], [], []>} : vector<10x32xbf16>, vector<32x32xbf16>, vector<10x32xf32> -> vector<10x32xf32>
    %c0_23 = arith.constant 0 : index
    %c0_24 = arith.constant 0 : index
    %c0_25 = arith.constant 0 : index
    %41 = vector.load %arg13[%c0_23, %c0_24, %c0_25] : memref<1x1x32xf32, #tpu.memory_space<vmem>>, vector<1x1x32xf32>
    %42 = vector.shape_cast %41 : vector<1x1x32xf32> to vector<1x32xf32>
    %43 = vector.broadcast %42 : vector<1x32xf32> to vector<10x32xf32>
    %44 = arith.addf %40, %43 : vector<10x32xf32>
    %c0_26 = arith.constant 0 : index
    %c0_27 = arith.constant 0 : index
    %c0_28 = arith.constant 0 : index
    %45 = vector.load %arg11[%c0_26, %c0_27, %c0_28] : memref<1x32x32xbf16, #tpu.memory_space<vmem>>, vector<1x32x32xbf16>
    %46 = vector.shape_cast %45 : vector<1x32x32xbf16> to vector<32x32xbf16>
    %cst_29 = arith.constant dense<0.000000e+00> : vector<10x32xf32>
    %47 = tpu.matmul %30, %46, %cst_29 {dimension_numbers = #tpu.dot_dimension_numbers<[1], [0], [0], [1], [0, 0, 1, 1], [], []>} : vector<10x32xbf16>, vector<32x32xbf16>, vector<10x32xf32> -> vector<10x32xf32>
    %c0_30 = arith.constant 0 : index
    %c0_31 = arith.constant 0 : index
    %c0_32 = arith.constant 0 : index
    %48 = vector.load %arg14[%c0_30, %c0_31, %c0_32] : memref<1x1x32xf32, #tpu.memory_space<vmem>>, vector<1x1x32xf32>
    %49 = vector.shape_cast %48 : vector<1x1x32xf32> to vector<1x32xf32>
    %50 = vector.broadcast %49 : vector<1x32xf32> to vector<10x32xf32>
    %51 = arith.addf %47, %50 : vector<10x32xf32>
    %cst_33 = arith.constant 0.353553385 : f32
    %52 = vector.broadcast %cst_33 : f32 to vector<10x32xf32>
    %53 = arith.mulf %37, %52 : vector<10x32xf32>
    %54 = vector.extract_strided_slice %53 {offsets = [0, 0], sizes = [10, 8], strides = [1, 1]} : vector<10x32xf32> to vector<10x8xf32>
    %55 = vector.extract_strided_slice %53 {offsets = [0, 8], sizes = [10, 8], strides = [1, 1]} : vector<10x32xf32> to vector<10x8xf32>
    %56 = vector.extract_strided_slice %53 {offsets = [0, 16], sizes = [10, 8], strides = [1, 1]} : vector<10x32xf32> to vector<10x8xf32>
    %57 = vector.extract_strided_slice %53 {offsets = [0, 24], sizes = [10, 8], strides = [1, 1]} : vector<10x32xf32> to vector<10x8xf32>
    %58 = vector.shape_cast %54 : vector<10x8xf32> to vector<1x10x8xf32>
    %59 = vector.shape_cast %55 : vector<10x8xf32> to vector<1x10x8xf32>
    %60 = vector.shape_cast %56 : vector<10x8xf32> to vector<1x10x8xf32>
    %61 = vector.shape_cast %57 : vector<10x8xf32> to vector<1x10x8xf32>
    %62 = tpu.concatenate %58, %59, %60, %61 in 0 : vector<1x10x8xf32>, vector<1x10x8xf32>, vector<1x10x8xf32>, vector<1x10x8xf32> -> vector<4x10x8xf32>
    %63 = arith.truncf %62 : vector<4x10x8xf32> to vector<4x10x8xbf16>
    %64 = vector.extract_strided_slice %44 {offsets = [0, 0], sizes = [10, 8], strides = [1, 1]} : vector<10x32xf32> to vector<10x8xf32>
    %65 = vector.extract_strided_slice %44 {offsets = [0, 8], sizes = [10, 8], strides = [1, 1]} : vector<10x32xf32> to vector<10x8xf32>
    %66 = vector.extract_strided_slice %44 {offsets = [0, 16], sizes = [10, 8], strides = [1, 1]} : vector<10x32xf32> to vector<10x8xf32>
    %67 = vector.extract_strided_slice %44 {offsets = [0, 24], sizes = [10, 8], strides = [1, 1]} : vector<10x32xf32> to vector<10x8xf32>
    %68 = vector.shape_cast %64 : vector<10x8xf32> to vector<1x10x8xf32>
    %69 = vector.shape_cast %65 : vector<10x8xf32> to vector<1x10x8xf32>
    %70 = vector.shape_cast %66 : vector<10x8xf32> to vector<1x10x8xf32>
    %71 = vector.shape_cast %67 : vector<10x8xf32> to vector<1x10x8xf32>
    %72 = tpu.concatenate %68, %69, %70, %71 in 0 : vector<1x10x8xf32>, vector<1x10x8xf32>, vector<1x10x8xf32>, vector<1x10x8xf32> -> vector<4x10x8xf32>
    %73 = arith.truncf %72 : vector<4x10x8xf32> to vector<4x10x8xbf16>
    %74 = vector.extract_strided_slice %51 {offsets = [0, 0], sizes = [10, 8], strides = [1, 1]} : vector<10x32xf32> to vector<10x8xf32>
    %75 = vector.extract_strided_slice %51 {offsets = [0, 8], sizes = [10, 8], strides = [1, 1]} : vector<10x32xf32> to vector<10x8xf32>
    %76 = vector.extract_strided_slice %51 {offsets = [0, 16], sizes = [10, 8], strides = [1, 1]} : vector<10x32xf32> to vector<10x8xf32>
    %77 = vector.extract_strided_slice %51 {offsets = [0, 24], sizes = [10, 8], strides = [1, 1]} : vector<10x32xf32> to vector<10x8xf32>
    %78 = vector.shape_cast %74 : vector<10x8xf32> to vector<1x10x8xf32>
    %79 = vector.shape_cast %75 : vector<10x8xf32> to vector<1x10x8xf32>
    %80 = vector.shape_cast %76 : vector<10x8xf32> to vector<1x10x8xf32>
    %81 = vector.shape_cast %77 : vector<10x8xf32> to vector<1x10x8xf32>
    %82 = tpu.concatenate %78, %79, %80, %81 in 0 : vector<1x10x8xf32>, vector<1x10x8xf32>, vector<1x10x8xf32>, vector<1x10x8xf32> -> vector<4x10x8xf32>
    %83 = arith.truncf %82 : vector<4x10x8xf32> to vector<4x10x8xbf16>
    "tpu.trace_start"() <{level = 10 : i32, message = "hqd,hkd->hqk"}> : () -> ()
    %cst_34 = arith.constant dense<0.000000e+00> : vector<4x10x10xf32>
    %84 = tpu.matmul %63, %73, %cst_34 {dimension_numbers = #tpu.dot_dimension_numbers<[2], [2], [1], [1], [0, 0, 0, 1, 1, 1], [0], [0]>} : vector<4x10x8xbf16>, vector<4x10x8xbf16>, vector<4x10x10xf32> -> vector<4x10x10xf32>
    "tpu.trace_stop"() : () -> ()
    %c0_35 = arith.constant 0 : index
    %c0_36 = arith.constant 0 : index
    %c0_37 = arith.constant 0 : index
    %85 = vector.load %arg6[%c0_35, %c0_36, %c0_37] : memref<1x10x10xf32, #tpu.memory_space<vmem>>, vector<1x10x10xf32>
    %86 = vector.broadcast %85 : vector<1x10x10xf32> to vector<4x10x10xf32>
    %87 = arith.addf %84, %86 : vector<4x10x10xf32>
    %cst_38 = arith.constant dense<0xFF800000> : vector<4x10xf32>
    %88 = vector.multi_reduction <maximumf>, %87, %cst_38 [2] : vector<4x10x10xf32> to vector<4x10xf32>
    %89 = vector.shape_cast %88 : vector<4x10xf32> to vector<4x10x1xf32>
    %90 = vector.broadcast %89 : vector<4x10x1xf32> to vector<4x10x10xf32>
    %91 = arith.subf %87, %90 : vector<4x10x10xf32>
    %92 = math.exp %91 : vector<4x10x10xf32>
    %cst_39 = arith.constant dense<0.000000e+00> : vector<4x10xf32>
    %93 = vector.multi_reduction <add>, %92, %cst_39 [2] : vector<4x10x10xf32> to vector<4x10xf32>
    %94 = vector.shape_cast %93 : vector<4x10xf32> to vector<4x10x1xf32>
    %95 = tpu.reciprocal %94 {approx = true} : vector<4x10x1xf32> -> vector<4x10x1xf32>
    %96 = vector.broadcast %95 : vector<4x10x1xf32> to vector<4x10x10xf32>
    %97 = arith.mulf %92, %96 : vector<4x10x10xf32>
    %98 = arith.truncf %97 : vector<4x10x10xf32> to vector<4x10x10xbf16>
    "tpu.trace_start"() <{level = 10 : i32, message = "hqk,hkd->hqd"}> : () -> ()
    %cst_40 = arith.constant dense<0.000000e+00> : vector<4x10x8xf32>
    %99 = tpu.matmul %98, %83, %cst_40 {dimension_numbers = #tpu.dot_dimension_numbers<[2], [1], [1], [2], [0, 0, 0, 1, 1, 2], [0], [0]>} : vector<4x10x10xbf16>, vector<4x10x8xbf16>, vector<4x10x8xf32> -> vector<4x10x8xf32>
    "tpu.trace_stop"() : () -> ()
    %100 = vector.extract_strided_slice %99 {offsets = [0, 0, 0], sizes = [1, 10, 8], strides = [1, 1, 1]} : vector<4x10x8xf32> to vector<1x10x8xf32>
    %101 = vector.shape_cast %100 : vector<1x10x8xf32> to vector<10x8xf32>
    %102 = vector.extract_strided_slice %99 {offsets = [1, 0, 0], sizes = [1, 10, 8], strides = [1, 1, 1]} : vector<4x10x8xf32> to vector<1x10x8xf32>
    %103 = vector.shape_cast %102 : vector<1x10x8xf32> to vector<10x8xf32>
    %104 = vector.extract_strided_slice %99 {offsets = [2, 0, 0], sizes = [1, 10, 8], strides = [1, 1, 1]} : vector<4x10x8xf32> to vector<1x10x8xf32>
    %105 = vector.shape_cast %104 : vector<1x10x8xf32> to vector<10x8xf32>
    %106 = vector.extract_strided_slice %99 {offsets = [3, 0, 0], sizes = [1, 10, 8], strides = [1, 1, 1]} : vector<4x10x8xf32> to vector<1x10x8xf32>
    %107 = vector.shape_cast %106 : vector<1x10x8xf32> to vector<10x8xf32>
    %108 = tpu.concatenate %101, %103, %105, %107 in 1 : vector<10x8xf32>, vector<10x8xf32>, vector<10x8xf32>, vector<10x8xf32> -> vector<10x32xf32>
    %109 = arith.truncf %108 : vector<10x32xf32> to vector<10x32xbf16>
    %c0_41 = arith.constant 0 : index
    %c0_42 = arith.constant 0 : index
    %c0_43 = arith.constant 0 : index
    %110 = vector.load %arg15[%c0_41, %c0_42, %c0_43] : memref<1x32x32xbf16, #tpu.memory_space<vmem>>, vector<1x32x32xbf16>
    %111 = vector.shape_cast %110 : vector<1x32x32xbf16> to vector<32x32xbf16>
    %cst_44 = arith.constant dense<0.000000e+00> : vector<10x32xf32>
    %112 = tpu.matmul %109, %111, %cst_44 {dimension_numbers = #tpu.dot_dimension_numbers<[1], [0], [0], [1], [0, 0, 1, 1], [], []>} : vector<10x32xbf16>, vector<32x32xbf16>, vector<10x32xf32> -> vector<10x32xf32>
    %c0_45 = arith.constant 0 : index
    %c0_46 = arith.constant 0 : index
    %c0_47 = arith.constant 0 : index
    %113 = vector.load %arg16[%c0_45, %c0_46, %c0_47] : memref<1x1x32xf32, #tpu.memory_space<vmem>>, vector<1x1x32xf32>
    %114 = vector.shape_cast %113 : vector<1x1x32xf32> to vector<1x32xf32>
    %115 = vector.broadcast %114 : vector<1x32xf32> to vector<10x32xf32>
    %116 = arith.addf %112, %115 : vector<10x32xf32>
    %117 = arith.addf %3, %116 : vector<10x32xf32>
    %c0_48 = arith.constant 0 : index
    %c0_49 = arith.constant 0 : index
    %c0_50 = arith.constant 0 : index
    %118 = vector.load %arg17[%c0_48, %c0_49, %c0_50] : memref<1x1x32xf32, #tpu.memory_space<vmem>>, vector<1x1x32xf32>
    %119 = vector.shape_cast %118 : vector<1x1x32xf32> to vector<1x32xf32>
    %c0_51 = arith.constant 0 : index
    %c0_52 = arith.constant 0 : index
    %c0_53 = arith.constant 0 : index
    %120 = vector.load %arg18[%c0_51, %c0_52, %c0_53] : memref<1x1x32xf32, #tpu.memory_space<vmem>>, vector<1x1x32xf32>
    %121 = vector.shape_cast %120 : vector<1x1x32xf32> to vector<1x32xf32>
    %cst_54 = arith.constant dense<0.000000e+00> : vector<10xf32>
    %122 = vector.multi_reduction <add>, %117, %cst_54 [1] : vector<10x32xf32> to vector<10xf32>
    %123 = vector.shape_cast %122 : vector<10xf32> to vector<10x1xf32>
    %cst_55 = arith.constant 3.200000e+01 : f32
    %124 = vector.broadcast %cst_55 : f32 to vector<10x1xf32>
    %125 = arith.divf %123, %124 : vector<10x1xf32>
    %126 = vector.broadcast %125 : vector<10x1xf32> to vector<10x32xf32>
    %127 = arith.subf %117, %126 : vector<10x32xf32>
    %128 = arith.mulf %127, %127 : vector<10x32xf32>
    %cst_56 = arith.constant dense<0.000000e+00> : vector<10xf32>
    %129 = vector.multi_reduction <add>, %128, %cst_56 [1] : vector<10x32xf32> to vector<10xf32>
    %130 = vector.shape_cast %129 : vector<10xf32> to vector<10x1xf32>
    %cst_57 = arith.constant 3.200000e+01 : f32
    %131 = vector.broadcast %cst_57 : f32 to vector<10x1xf32>
    %132 = arith.divf %130, %131 : vector<10x1xf32>
    %133 = vector.broadcast %125 : vector<10x1xf32> to vector<10x32xf32>
    %134 = arith.subf %117, %133 : vector<10x32xf32>
    %cst_58 = arith.constant 9.99999997E-7 : f32
    %135 = vector.broadcast %cst_58 : f32 to vector<10x1xf32>
    %136 = arith.addf %132, %135 : vector<10x1xf32>
    %137 = math.rsqrt %136 : vector<10x1xf32>
    %138 = vector.broadcast %137 : vector<10x1xf32> to vector<10x32xf32>
    %139 = arith.mulf %134, %138 : vector<10x32xf32>
    %140 = vector.broadcast %119 : vector<1x32xf32> to vector<10x32xf32>
    %141 = arith.mulf %139, %140 : vector<10x32xf32>
    %142 = vector.broadcast %121 : vector<1x32xf32> to vector<10x32xf32>
    %143 = arith.addf %141, %142 : vector<10x32xf32>
    %144 = arith.truncf %143 : vector<10x32xf32> to vector<10x32xbf16>
    %c0_59 = arith.constant 0 : index
    %c0_60 = arith.constant 0 : index
    %c0_61 = arith.constant 0 : index
    %145 = vector.load %arg19[%c0_59, %c0_60, %c0_61] : memref<1x32x128xbf16, #tpu.memory_space<vmem>>, vector<1x32x128xbf16>
    %146 = vector.shape_cast %145 : vector<1x32x128xbf16> to vector<32x128xbf16>
    %cst_62 = arith.constant dense<0.000000e+00> : vector<10x128xf32>
    %147 = tpu.matmul %144, %146, %cst_62 {dimension_numbers = #tpu.dot_dimension_numbers<[1], [0], [0], [1], [0, 0, 1, 1], [], []>} : vector<10x32xbf16>, vector<32x128xbf16>, vector<10x128xf32> -> vector<10x128xf32>
    %c0_63 = arith.constant 0 : index
    %c0_64 = arith.constant 0 : index
    %c0_65 = arith.constant 0 : index
    %148 = vector.load %arg20[%c0_63, %c0_64, %c0_65] : memref<1x1x128xf32, #tpu.memory_space<vmem>>, vector<1x1x128xf32>
    %149 = vector.shape_cast %148 : vector<1x1x128xf32> to vector<1x128xf32>
    %150 = vector.broadcast %149 : vector<1x128xf32> to vector<10x128xf32>
    %151 = arith.addf %147, %150 : vector<10x128xf32>
    %cst_66 = arith.constant 5.000000e-01 : f32
    %152 = vector.broadcast %cst_66 : f32 to vector<10x128xf32>
    %153 = arith.mulf %152, %151 : vector<10x128xf32>
    %cst_67 = arith.constant 4.471500e-02 : f32
    %154 = vector.broadcast %cst_67 : f32 to vector<10x128xf32>
    %155 = arith.mulf %154, %151 : vector<10x128xf32>
    %156 = arith.mulf %155, %151 : vector<10x128xf32>
    %157 = arith.mulf %156, %151 : vector<10x128xf32>
    %158 = arith.addf %151, %157 : vector<10x128xf32>
    %cst_68 = arith.constant 0.797884583 : f32
    %159 = vector.broadcast %cst_68 : f32 to vector<10x128xf32>
    %160 = arith.mulf %159, %158 : vector<10x128xf32>
    %161 = math.tanh %160 : vector<10x128xf32>
    %cst_69 = arith.constant 1.000000e+00 : f32
    %162 = vector.broadcast %cst_69 : f32 to vector<10x128xf32>
    %163 = arith.addf %162, %161 : vector<10x128xf32>
    %164 = arith.mulf %153, %163 : vector<10x128xf32>
    %165 = arith.truncf %164 : vector<10x128xf32> to vector<10x128xbf16>
    %c0_70 = arith.constant 0 : index
    %c0_71 = arith.constant 0 : index
    %c0_72 = arith.constant 0 : index
    %166 = vector.load %arg21[%c0_70, %c0_71, %c0_72] : memref<1x128x32xbf16, #tpu.memory_space<vmem>>, vector<1x128x32xbf16>
    %167 = vector.shape_cast %166 : vector<1x128x32xbf16> to vector<128x32xbf16>
    %cst_73 = arith.constant dense<0.000000e+00> : vector<10x32xf32>
    %168 = tpu.matmul %165, %167, %cst_73 {dimension_numbers = #tpu.dot_dimension_numbers<[1], [0], [0], [1], [0, 0, 1, 1], [], []>} : vector<10x128xbf16>, vector<128x32xbf16>, vector<10x32xf32> -> vector<10x32xf32>
    %c0_74 = arith.constant 0 : index
    %c0_75 = arith.constant 0 : index
    %c0_76 = arith.constant 0 : index
    %169 = vector.load %arg22[%c0_74, %c0_75, %c0_76] : memref<1x1x32xf32, #tpu.memory_space<vmem>>, vector<1x1x32xf32>
    %170 = vector.shape_cast %169 : vector<1x1x32xf32> to vector<1x32xf32>
    %171 = vector.broadcast %170 : vector<1x32xf32> to vector<10x32xf32>
    %172 = arith.addf %168, %171 : vector<10x32xf32>
    %173 = arith.addf %117, %172 : vector<10x32xf32>
    %c0_77 = arith.constant 0 : index
    %c0_78 = arith.constant 0 : index
    %174 = vector.load %arg26[%c0_77, %c0_78] : memref<10x32xf32, #tpu.memory_space<vmem>>, vector<10x32xf32>
    tpu.vector_store %arg26[%c0_77, %c0_78], %173 {strides = array<i32>} : memref<10x32xf32, #tpu.memory_space<vmem>>, vector<10x32xf32>,
    %c1_i32 = arith.constant 1 : i32
    %175 = arith.cmpi eq, %arg0, %c1_i32 : i32
    %176 = arith.extui %175 : i1 to i32
    %c0_i32_79 = arith.constant 0 : i32
    %177 = arith.cmpi ne, %176, %c0_i32_79 : i32
    scf.if %177 {
      %178 = vector.extract_strided_slice %173 {offsets = [0, 0], sizes = [1, 32], strides = [1, 1]} : vector<10x32xf32> to vector<1x32xf32>
      %179 = vector.extract_strided_slice %173 {offsets = [5, 0], sizes = [1, 32], strides = [1, 1]} : vector<10x32xf32> to vector<1x32xf32>
      %180 = tpu.concatenate %178, %179 in 0 : vector<1x32xf32>, vector<1x32xf32> -> vector<2x32xf32>
      %c0_80 = arith.constant 0 : index
      %c0_81 = arith.constant 0 : index
      %181 = vector.load %arg23[%c0_80, %c0_81] : memref<1x32xf32, #tpu.memory_space<vmem>>, vector<1x32xf32>
      %c0_82 = arith.constant 0 : index
      %c0_83 = arith.constant 0 : index
      %182 = vector.load %arg24[%c0_82, %c0_83] : memref<1x32xf32, #tpu.memory_space<vmem>>, vector<1x32xf32>
      %cst_84 = arith.constant dense<0.000000e+00> : vector<2xf32>
      %183 = vector.multi_reduction <add>, %180, %cst_84 [1] : vector<2x32xf32> to vector<2xf32>
      %184 = vector.shape_cast %183 : vector<2xf32> to vector<2x1xf32>
      %cst_85 = arith.constant 3.200000e+01 : f32
      %185 = vector.broadcast %cst_85 : f32 to vector<2x1xf32>
      %186 = arith.divf %184, %185 : vector<2x1xf32>
      %187 = vector.broadcast %186 : vector<2x1xf32> to vector<2x32xf32>
      %188 = arith.subf %180, %187 : vector<2x32xf32>
      %189 = arith.mulf %188, %188 : vector<2x32xf32>
      %cst_86 = arith.constant dense<0.000000e+00> : vector<2xf32>
      %190 = vector.multi_reduction <add>, %189, %cst_86 [1] : vector<2x32xf32> to vector<2xf32>
      %191 = vector.shape_cast %190 : vector<2xf32> to vector<2x1xf32>
      %cst_87 = arith.constant 3.200000e+01 : f32
      %192 = vector.broadcast %cst_87 : f32 to vector<2x1xf32>
      %193 = arith.divf %191, %192 : vector<2x1xf32>
      %194 = vector.broadcast %186 : vector<2x1xf32> to vector<2x32xf32>
      %195 = arith.subf %180, %194 : vector<2x32xf32>
      %cst_88 = arith.constant 9.99999997E-7 : f32
      %196 = vector.broadcast %cst_88 : f32 to vector<2x1xf32>
      %197 = arith.addf %193, %196 : vector<2x1xf32>
      %198 = math.rsqrt %197 : vector<2x1xf32>
      %199 = vector.broadcast %198 : vector<2x1xf32> to vector<2x32xf32>
      %200 = arith.mulf %195, %199 : vector<2x32xf32>
      %201 = vector.broadcast %181 : vector<1x32xf32> to vector<2x32xf32>
      %202 = arith.mulf %200, %201 : vector<2x32xf32>
      %203 = vector.broadcast %182 : vector<1x32xf32> to vector<2x32xf32>
      %204 = arith.addf %202, %203 : vector<2x32xf32>
      %c0_89 = arith.constant 0 : index
      %c0_90 = arith.constant 0 : index
      %205 = vector.load %arg25[%c0_89, %c0_90] : memref<2x32xf32, #tpu.memory_space<vmem>>, vector<2x32xf32>
      tpu.vector_store %arg25[%c0_89, %c0_90], %204 {strides = array<i32>} : memref<2x32xf32, #tpu.memory_space<vmem>>, vector<2x32xf32>,
    } else {
    }
    return
  }
  func.func @transform_0(%arg0: i32) -> (i32, i32) {
    %c0_i32 = arith.constant 0 : i32
    %c0_i32_0 = arith.constant 0 : i32
    %c0_i32_1 = arith.constant 0 : i32
    return %c0_i32, %c0_i32_0 : i32, i32
  }
  func.func @transform_1(%arg0: i32) -> (i32, i32) {
    %c0_i32 = arith.constant 0 : i32
    %c0_i32_0 = arith.constant 0 : i32
    %c0_i32_1 = arith.constant 0 : i32
    return %c0_i32, %c0_i32_0 : i32, i32
  }
  func.func @transform_2(%arg0: i32) -> (i32, i32) {
    %c0_i32 = arith.constant 0 : i32
    %c0_i32_0 = arith.constant 0 : i32
    %c0_i32_1 = arith.constant 0 : i32
    return %c0_i32, %c0_i32_0 : i32, i32
  }
  func.func @transform_3(%arg0: i32) -> (i32, i32) {
    %c0_i32 = arith.constant 0 : i32
    %c0_i32_0 = arith.constant 0 : i32
    %c0_i32_1 = arith.constant 0 : i32
    return %c0_i32, %c0_i32_0 : i32, i32
  }
  func.func @transform_4(%arg0: i32) -> (i32, i32) {
    %c0_i32 = arith.constant 0 : i32
    %c0_i32_0 = arith.constant 0 : i32
    %c0_i32_1 = arith.constant 0 : i32
    return %c0_i32, %c0_i32_0 : i32, i32
  }
  func.func @transform_5(%arg0: i32) -> (i32, i32, i32) {
    %c0_i32 = arith.constant 0 : i32
    %c0_i32_0 = arith.constant 0 : i32
    %c0_i32_1 = arith.constant 0 : i32
    %c0_i32_2 = arith.constant 0 : i32
    return %c0_i32, %c0_i32_0, %c0_i32_1 : i32, i32, i32
  }
  func.func @transform_6(%arg0: i32) -> (i32, i32, i32) {
    %c0_i32 = arith.constant 0 : i32
    %c0_i32_0 = arith.constant 0 : i32
    %c0_i32_1 = arith.constant 0 : i32
    return %arg0, %c0_i32, %c0_i32_0 : i32, i32, i32
  }
  func.func @transform_7(%arg0: i32) -> (i32, i32, i32) {
    %c0_i32 = arith.constant 0 : i32
    %c0_i32_0 = arith.constant 0 : i32
    %c0_i32_1 = arith.constant 0 : i32
    return %arg0, %c0_i32, %c0_i32_0 : i32, i32, i32
  }
  func.func @transform_8(%arg0: i32) -> (i32, i32, i32) {
    %c0_i32 = arith.constant 0 : i32
    %c0_i32_0 = arith.constant 0 : i32
    %c0_i32_1 = arith.constant 0 : i32
    return %arg0, %c0_i32, %c0_i32_0 : i32, i32, i32
  }
  func.func @transform_9(%arg0: i32) -> (i32, i32, i32) {
    %c0_i32 = arith.constant 0 : i32
    %c0_i32_0 = arith.constant 0 : i32
    %c0_i32_1 = arith.constant 0 : i32
    return %arg0, %c0_i32, %c0_i32_0 : i32, i32, i32
  }
  func.func @transform_10(%arg0: i32) -> (i32, i32, i32) {
    %c0_i32 = arith.constant 0 : i32
    %c0_i32_0 = arith.constant 0 : i32
    %c0_i32_1 = arith.constant 0 : i32
    return %arg0, %c0_i32, %c0_i32_0 : i32, i32, i32
  }
  func.func @transform_11(%arg0: i32) -> (i32, i32, i32) {
    %c0_i32 = arith.constant 0 : i32
    %c0_i32_0 = arith.constant 0 : i32
    %c0_i32_1 = arith.constant 0 : i32
    return %arg0, %c0_i32, %c0_i32_0 : i32, i32, i32
  }
  func.func @transform_12(%arg0: i32) -> (i32, i32, i32) {
    %c0_i32 = arith.constant 0 : i32
    %c0_i32_0 = arith.constant 0 : i32
    %c0_i32_1 = arith.constant 0 : i32
    return %arg0, %c0_i32, %c0_i32_0 : i32, i32, i32
  }
  func.func @transform_13(%arg0: i32) -> (i32, i32, i32) {
    %c0_i32 = arith.constant 0 : i32
    %c0_i32_0 = arith.constant 0 : i32
    %c0_i32_1 = arith.constant 0 : i32
    return %arg0, %c0_i32, %c0_i32_0 : i32, i32, i32
  }
  func.func @transform_14(%arg0: i32) -> (i32, i32, i32) {
    %c0_i32 = arith.constant 0 : i32
    %c0_i32_0 = arith.constant 0 : i32
    %c0_i32_1 = arith.constant 0 : i32
    return %arg0, %c0_i32, %c0_i32_0 : i32, i32, i32
  }
  func.func @transform_15(%arg0: i32) -> (i32, i32, i32) {
    %c0_i32 = arith.constant 0 : i32
    %c0_i32_0 = arith.constant 0 : i32
    %c0_i32_1 = arith.constant 0 : i32
    return %arg0, %c0_i32, %c0_i32_0 : i32, i32, i32
  }
  func.func @transform_16(%arg0: i32) -> (i32, i32, i32) {
    %c0_i32 = arith.constant 0 : i32
    %c0_i32_0 = arith.constant 0 : i32
    %c0_i32_1 = arith.constant 0 : i32
    return %arg0, %c0_i32, %c0_i32_0 : i32, i32, i32
  }
  func.func @transform_17(%arg0: i32) -> (i32, i32, i32) {
    %c0_i32 = arith.constant 0 : i32
    %c0_i32_0 = arith.constant 0 : i32
    %c0_i32_1 = arith.constant 0 : i32
    return %arg0, %c0_i32, %c0_i32_0 : i32, i32, i32
  }
  func.func @transform_18(%arg0: i32) -> (i32, i32, i32) {
    %c0_i32 = arith.constant 0 : i32
    %c0_i32_0 = arith.constant 0 : i32
    %c0_i32_1 = arith.constant 0 : i32
    return %arg0, %c0_i32, %c0_i32_0 : i32, i32, i32
  }
  func.func @transform_19(%arg0: i32) -> (i32, i32, i32) {
    %c0_i32 = arith.constant 0 : i32
    %c0_i32_0 = arith.constant 0 : i32
    %c0_i32_1 = arith.constant 0 : i32
    return %arg0, %c0_i32, %c0_i32_0 : i32, i32, i32
  }
  func.func @transform_20(%arg0: i32) -> (i32, i32, i32) {
    %c0_i32 = arith.constant 0 : i32
    %c0_i32_0 = arith.constant 0 : i32
    %c0_i32_1 = arith.constant 0 : i32
    return %arg0, %c0_i32, %c0_i32_0 : i32, i32, i32
  }
  func.func @transform_21(%arg0: i32) -> (i32, i32, i32) {
    %c0_i32 = arith.constant 0 : i32
    %c0_i32_0 = arith.constant 0 : i32
    %c0_i32_1 = arith.constant 0 : i32
    return %arg0, %c0_i32, %c0_i32_0 : i32, i32, i32
  }
  func.func @transform_22(%arg0: i32) -> (i32, i32) {
    %c0_i32 = arith.constant 0 : i32
    %c0_i32_0 = arith.constant 0 : i32
    %c0_i32_1 = arith.constant 0 : i32
    return %c0_i32, %c0_i32_0 : i32, i32
  }
  func.func @transform_23(%arg0: i32) -> (i32, i32) {
    %c0_i32 = arith.constant 0 : i32
    %c0_i32_0 = arith.constant 0 : i32
    %c0_i32_1 = arith.constant 0 : i32
    return %c0_i32, %c0_i32_0 : i32, i32
  }
  func.func @transform_24(%arg0: i32) -> (i32, i32) {
    %c0_i32 = arith.constant 0 : i32
    %c0_i32_0 = arith.constant 0 : i32
    %c0_i32_1 = arith.constant 0 : i32
    return %c0_i32, %c0_i32_0 : i32, i32
  }
}

</mosaic_0001>

<bundles_post_ra>
// kernel: vit_forward.1
= control target key start
LH: loop header
LB: loop body
LE: loop exit
PB: predicated region body
PF: predicated region fallthrough
CT: control target
= control target key end

     0   :  { %s4040_s0 = inlined_call_operand.vmem [shape: bf16[8,1024], index: 0, kind: input, shape index: {}]   ;;  %s4041_s1 = inlined_call_operand.vmem [shape: bf16[1024,32], index: 1, kind: input, shape index: {}]   ;;  %s4042_s2 = inlined_call_operand.vmem [shape: f32[1,32], index: 2, kind: input, shape index: {}]   ;;  %s4043_s3 = inlined_call_operand.vmem [shape: f32[1,32], index: 3, kind: input, shape index: {}]   ;;  %s4044_s4 = inlined_call_operand.vmem [shape: f32[4,32], index: 4, kind: input, shape index: {}]   ;;  %s4045_s5 = inlined_call_operand.vmem [shape: f32[1,10,10], index: 5, kind: input, shape index: {}]   ;;  %s4046_s6 = inlined_call_operand.vmem [shape: f32[2,1,32], index: 6, kind: input, shape index: {}]   ;;  %s4047_s7 = inlined_call_operand.vmem [shape: f32[2,1,32], index: 7, kind: input, shape index: {}]   ;;  %s4048_s8 = inlined_call_operand.vmem [shape: bf16[2,32,32], index: 8, kind: input, shape index: {}]   ;;  %s4049_s9 = inlined_call_operand.vmem [shape: bf16[2,32,32], index: 9, kind: input, shape index: {}]   ;;  %s4050_s10 = inlined_call_operand.vmem [shape: bf16[2,32,32], index: 10, kind: input, shape index: {}]   ;;  %s4051_s11 = inlined_call_operand.vmem [shape: f32[2,1,32], index: 11, kind: input, shape index: {}]   ;;  %s4052_s12 = inlined_call_operand.vmem [shape: f32[2,1,32], index: 12, kind: input, shape index: {}]   ;;  %s4053_s13 = inlined_call_operand.vmem [shape: f32[2,1,32], index: 13, kind: input, shape index: {}]   ;;  %s4054_s14 = inlined_call_operand.vmem [shape: bf16[2,32,32], index: 14, kind: input, shape index: {}]   ;;  %s4055_s15 = inlined_call_operand.vmem [shape: f32[2,1,32], index: 15, kind: input, shape index: {}]   ;;  %s4056_s16 = inlined_call_operand.vmem [shape: f32[2,1,32], index: 16, kind: input, shape index: {}]   ;;  %s4057_s17 = inlined_call_operand.vmem [shape: f32[2,1,32], index: 17, kind: input, shape index: {}]   ;;  %s4058_s18 = inlined_call_operand.vmem [shape: bf16[2,32,128], index: 18, kind: input, shape index: {}]   ;;  %s4059_s19 = inlined_call_operand.vmem [shape: f32[2,1,128], index: 19, kind: input, shape index: {}]   ;;  %s4060_s20 = inlined_call_operand.vmem [shape: bf16[2,128,32], index: 20, kind: input, shape index: {}]   ;;  %s4061_s21 = inlined_call_operand.vmem [shape: f32[2,1,32], index: 21, kind: input, shape index: {}]   ;;  %s4062_s22 = inlined_call_operand.vmem [shape: f32[1,32], index: 22, kind: input, shape index: {}]   ;;  %s4063_s23 = inlined_call_operand.vmem [shape: f32[1,32], index: 23, kind: input, shape index: {}]   ;;  %s4064_s24 = inlined_call_operand.hbm [shape: f32[2,32], index: 24, kind: output, shape index: {}]  }
   0x1   :  { %4071 = sst [smem:[#allocation8_spill]] %s4040_s0 }
   0x2   :  { %4072 = sst [smem:[#allocation9_spill]] %s4041_s1 }
   0x3   :  { %4073 = sst [smem:[#allocation10_spill]] %s4042_s2 }
   0x4   :  { %4074 = sst [smem:[#allocation11_spill]] %s4043_s3 }
   0x5   :  { %4075 = sst [smem:[#allocation12_spill]] %s4044_s4 }
   0x6   :  { %4076 = sst [smem:[#allocation13_spill]] %s4045_s5 }
   0x7   :  { %4077 = sst [smem:[#allocation14_spill]] %s4046_s6 }
   0x8   :  { %4078 = sst [smem:[#allocation15_spill]] %s4047_s7 }
   0x9   :  { %4079 = sst [smem:[#allocation16_spill]] %s4048_s8 }
   0xa   :  { %4080 = sst [smem:[#allocation17_spill]] %s4049_s9 }
   0xb   :  { %4081 = sst [smem:[#allocation18_spill]] %s4050_s10 }
   0xc   :  { %4082 = sst [smem:[#allocation19_spill]] %s4051_s11 }
   0xd   :  { %4083 = sst [smem:[#allocation20_spill]] %s4054_s14 }
   0xe   :  { %4084 = sst [smem:[#allocation21_spill]] %s4062_s22 }
   0xf   :  { %4085 = sst [smem:[#allocation22_spill]] %s4063_s23 }
  0x10   :  { %4086 = sst [smem:[#allocation23_spill]] %s4064_s24 }
  0x11   :  { %29 = vsyncpa [#allocation4], 0  ;;  %s3527_s5 = smov 0  }
  0x12 LB: > { %4087 = sst [smem:[#allocation6_spill]] %s3392_s5  ;;  %s3533_s26 = sadd.s32 4294967295, %s3392_s5   ;;  %s3392_s5 = sphi %s3527_s5, %s35_s5  }
  0x13   : > { %4088 = sst [smem:[#allocation7_spill]] %s3533_s26  ;;  %p2762_p0 = scmp.ge.s32.totalorder %s3392_s5, 1 }
  0x14   : > { %p788_p1 = scmp.lt.s32.totalorder %s3392_s5, 3 }
  0x16   : > { %p789_p2 = pnand %p2762_p0, %p788_p1 }
  0x17   : > { %p904_p3 = scmp.lt.s32.totalorder (!%p789_p2), %s3533_s26, 1  ;;  %s4092_s5 = sld [smem:[#allocation16_spill]] (!%p789_p2) }
  0x18   : > { %792 = sbr.rel (%p789_p2) target bundleno = 2496 (0x9c0), region = 116  ;;  %s4093_s9 = sld [smem:[#allocation17_spill]] (!%p789_p2) }
  0x19   : > { %s4094_s10 = sld [smem:[#allocation18_spill]] (!%p789_p2) }
  0x1a   : > { %s4095_s14 = sld [smem:[#allocation20_spill]] (!%p789_p2) }
  0x1b   : > { %s4096_s7 = sld [smem:[#allocation7_spill]] (!%p789_p2) }
  0x1d   : > { %s3539_s27 = scalar_select %p904_p3, %s3533_s26, 1 }
  0x1f   : > { %s3122_s25 = sshll.u32 %s3539_s27, 4  ;;  %s963_s11 = scalar_lea.vmem %s4061_s21, %s3539_s27 }
  0x20   : > { %s3557_s24 = scalar_lea.vmem %s4092_s5, %s3122_s25  ;;  %s3562_s26 = scalar_lea.vmem %s4093_s9, %s3122_s25 }
  0x21   : > { %s3567_s0 = scalar_lea.vmem %s4094_s10, %s3122_s25  ;;  %s3580_s3 = scalar_lea.vmem %s4095_s14, %s3122_s25 }
  0x22   : > { %s944_s10 = scalar_lea.vmem %s4056_s16, %s3539_s27  ;;  %s3597_s4 = scalar_lea.vmem %s4058_s18, %s3122_s25 }
  0x23   : > { %s3127_s14 = sshll.u32 %s3539_s27, 6  ;;  %p2775_p4 = scmp.ne.s32.totalorder %s4096_s7, 0 }
  0x24   : > { %s3607_s9 = scalar_lea.vmem %s4060_s20, %s3127_s14  ;;  %s4097_s1 = sld [smem:[#allocation9_spill]] (!%p2775_p4) }
  0x25   : > { %968 = sbr.rel (%p2775_p4) target bundleno = 252 (0xfc), region = 120  ;;  %s4098_s2 = sld [smem:[#allocation8_spill]] (!%p2775_p4) }
  0x26   : > { %s4099_s28 = sld [smem:[#allocation10_spill]] (!%p2775_p4) }
  0x27   : > { %s4100_s6 = sld [smem:[#allocation12_spill]] (!%p2775_p4) }
  0x28   : > { %s4101_s23 = sld [smem:[#allocation11_spill]] (!%p2775_p4) }
  0x2a   : > { %v3135_v0 = vld [vmem:[%s4097_s1 + $0x38] sm:$0xff]  ;;  %v3134_v4 = vld [vmem:[%s4097_s1 + $0x30] sm:$0xff]  ;;  %v3133_v8 = vld [vmem:[%s4097_s1 + $0x28] sm:$0xff]  ;;  %vm1637_vm0 = vcmask 1040384   ;;  %vm1645_vm1 = vcmask 254976   ;;  %vm1639_vm2 = vcmask 1044480  }
  0x2b   : > { %v3143_v1 = vld [vmem:[%s4097_s1 + $0x78] sm:$0xff]  ;;  %1517 = vmatpush.bf16.msra.mxu0 %v3135_v0  ;;  %v3142_v5 = vld [vmem:[%s4097_s1 + $0x70] sm:$0xff]  ;;  %v3141_v9 = vld [vmem:[%s4097_s1 + $0x68] sm:$0xff]  ;;  %vm1641_vm3 = vcmask 1045504   ;;  %vm1643_vm4 = vcmask 261120  }
  0x2c   : > { %v3151_v2 = vld [vmem:[%s4097_s1 + $0xb8] sm:$0xff]  ;;  %1530 = vmatpush.bf16.msra.mxu1 %v3143_v1  ;;  %v3150_v6 = vld [vmem:[%s4097_s1 + $0xb0] sm:$0xff]  ;;  %v3149_v10 = vld [vmem:[%s4097_s1 + $0xa8] sm:$0xff] }
  0x2d   : > { %v3159_v3 = vld [vmem:[%s4097_s1 + $0xf8] sm:$0xff]  ;;  %1543 = vmatpush.bf16.msra.mxu2 %v3151_v2  ;;  %v3158_v7 = vld [vmem:[%s4097_s1 + $0xf0] sm:$0xff]  ;;  %v3157_v11 = vld [vmem:[%s4097_s1 + $0xe8] sm:$0xff] }
  0x2e   : > { %1556 = vmatpush.bf16.msra.mxu3 %v3159_v3  ;;  %v3132_v12 = vld [vmem:[%s4097_s1 + $0x20] sm:$0xff]  ;;  %v3131_v16 = vld [vmem:[%s4097_s1 + $0x18] sm:$0xff]  ;;  %v3130_v20 = vld [vmem:[%s4097_s1 + $0x10] sm:$0xff] }
  0x2f   : > { %1518 = vmatpush.bf16.msra.mxu0 %v3134_v4  ;;  %v3140_v13 = vld [vmem:[%s4097_s1 + $0x60] sm:$0xff]  ;;  %v3139_v17 = vld [vmem:[%s4097_s1 + $0x58] sm:$0xff]  ;;  %v3138_v21 = vld [vmem:[%s4097_s1 + $0x50] sm:$0xff] }
  0x30   : > { %1531 = vmatpush.bf16.msra.mxu1 %v3142_v5  ;;  %v3148_v14 = vld [vmem:[%s4097_s1 + $0xa0] sm:$0xff]  ;;  %v3147_v18 = vld [vmem:[%s4097_s1 + $0x98] sm:$0xff]  ;;  %v3146_v22 = vld [vmem:[%s4097_s1 + $0x90] sm:$0xff] }
  0x31   : > { %1544 = vmatpush.bf16.msra.mxu2 %v3150_v6  ;;  %v3156_v15 = vld [vmem:[%s4097_s1 + $0xe0] sm:$0xff]  ;;  %v3155_v19 = vld [vmem:[%s4097_s1 + $0xd8] sm:$0xff]  ;;  %v3154_v23 = vld [vmem:[%s4097_s1 + $0xd0] sm:$0xff] }
  0x32   : > { %1557 = vmatpush.bf16.msra.mxu3 %v3158_v7  ;;  %v3129_v24 = vld [vmem:[%s4097_s1 + $0x8] sm:$0xff]  ;;  %v969_v29 = vld [vmem:[%s4098_s2] sm:$0xff]  ;;  %v3167_v38 = vld [vmem:[%s4097_s1 + $0x138] sm:$0xff] }
  0x33   : > { %1519 = vmatpush.bf16.msra.mxu0 %v3133_v8  ;;  %v3137_v25 = vld [vmem:[%s4097_s1 + $0x48] sm:$0xff]  ;;  %v3128_v30 = vld [vmem:[%s4097_s1] sm:$0xff]  ;;  %v1109_v33 = vunpack.c.l.b16 %v969_v29  ;;  %v1110_v37 = vunpack.c.h.b16 %v969_v29  ;;  %v3175_v39 = vld [vmem:[%s4097_s1 + $0x178] sm:$0xff] }
  0x34   : > { %1532 = vmatpush.bf16.msra.mxu1 %v3141_v9  ;;  %v3145_v26 = vld [vmem:[%s4097_s1 + $0x88] sm:$0xff]  ;;  %v3136_v31 = vld [vmem:[%s4097_s1 + $0x40] sm:$0xff]  ;;  %v3183_v40 = vld [vmem:[%s4097_s1 + $0x1b8] sm:$0xff] }
  0x35   : > { %1545 = vmatpush.bf16.msra.mxu2 %v3149_v10  ;;  %v3153_v27 = vld [vmem:[%s4097_s1 + $0xc8] sm:$0xff]  ;;  %v3144_v34 = vld [vmem:[%s4097_s1 + $0x80] sm:$0xff]  ;;  %v3191_v41 = vld [vmem:[%s4097_s1 + $0x1f8] sm:$0xff]  ;;  %v1117_v43 = vpack.c.b16 %v1109_v33, %v1109_v33  ;;  %v1118_v45 = vpack.c.b16 %v1110_v37, %v1110_v37 }
  0x36   : > { %1558 = vmatpush.bf16.msra.mxu3 %v3157_v11  ;;  %v970_v28 = vld [vmem:[%s4098_s2 + $0x8] sm:$0xff]  ;;  %v3152_v35 = vld [vmem:[%s4097_s1 + $0xc0] sm:$0xff]  ;;  %v3166_v46 = vld [vmem:[%s4097_s1 + $0x130] sm:$0xff] }
  0x37   : > { %1520 = vmatpush.bf16.msra.mxu0 %v3132_v12  ;;  %v1111_v32 = vunpack.c.l.b16 %v970_v28  ;;  %v1112_v36 = vunpack.c.h.b16 %v970_v28  ;;  %v3174_v47 = vld [vmem:[%s4097_s1 + $0x170] sm:$0xff]  ;;  %v3165_v50 = vld [vmem:[%s4097_s1 + $0x128] sm:$0xff]  ;;  %v3164_v54 = vld [vmem:[%s4097_s1 + $0x120] sm:$0xff] }
  0x38   : > { %1533 = vmatpush.bf16.msra.mxu1 %v3140_v13  ;;  %v3182_v48 = vld [vmem:[%s4097_s1 + $0x1b0] sm:$0xff]  ;;  %v3173_v51 = vld [vmem:[%s4097_s1 + $0x168] sm:$0xff]  ;;  %v3172_v55 = vld [vmem:[%s4097_s1 + $0x160] sm:$0xff] }
  0x39   : > { %1546 = vmatpush.bf16.msra.mxu2 %v3148_v14  ;;  %v1119_v42 = vpack.c.b16 %v1111_v32, %v1111_v32  ;;  %v1120_v44 = vpack.c.b16 %v1112_v36, %v1112_v36  ;;  %v3190_v49 = vld [vmem:[%s4097_s1 + $0x1f0] sm:$0xff]  ;;  %v3181_v52 = vld [vmem:[%s4097_s1 + $0x1a8] sm:$0xff]  ;;  %v3180_v56 = vld [vmem:[%s4097_s1 + $0x1a0] sm:$0xff] }
  0x3a   : > { %1559 = vmatpush.bf16.msra.mxu3 %v3156_v15  ;;  %v3189_v53 = vld [vmem:[%s4097_s1 + $0x1e8] sm:$0xff]  ;;  %v3188_v57 = vld [vmem:[%s4097_s1 + $0x1e0] sm:$0xff]  ;;  %v3163_v58 = vld [vmem:[%s4097_s1 + $0x118] sm:$0xff] }
  0x3b   : > { %1521 = vmatpush.bf16.msra.mxu0 %v3131_v16  ;;  %v3171_v59 = vld [vmem:[%s4097_s1 + $0x158] sm:$0xff]  ;;  %v3162_v62 = vld [vmem:[%s4097_s1 + $0x110] sm:$0xff]  ;;  %v3161_v2 = vld [vmem:[%s4097_s1 + $0x108] sm:$0xff] }
  0x3c   : > { %1534 = vmatpush.bf16.msra.mxu1 %v3139_v17  ;;  %v3179_v60 = vld [vmem:[%s4097_s1 + $0x198] sm:$0xff]  ;;  %v3170_v63 = vld [vmem:[%s4097_s1 + $0x150] sm:$0xff]  ;;  %v3169_v3 = vld [vmem:[%s4097_s1 + $0x148] sm:$0xff] }
  0x3d   : > { %1547 = vmatpush.bf16.msra.mxu2 %v3147_v18  ;;  %v3187_v61 = vld [vmem:[%s4097_s1 + $0x1d8] sm:$0xff]  ;;  %v3178_v0 = vld [vmem:[%s4097_s1 + $0x190] sm:$0xff]  ;;  %v3177_v5 = vld [vmem:[%s4097_s1 + $0x188] sm:$0xff] }
  0x3e   : > { %1560 = vmatpush.bf16.msra.mxu3 %v3155_v19  ;;  %v3186_v1 = vld [vmem:[%s4097_s1 + $0x1d0] sm:$0xff]  ;;  %v3185_v6 = vld [vmem:[%s4097_s1 + $0x1c8] sm:$0xff]  ;;  %v972_v7 = vld [vmem:[%s4098_s2 + $0x18] sm:$0xff] }
  0x3f   : > { %1522 = vmatpush.bf16.msra.mxu0 %v3130_v20  ;;  %v971_v4 = vld [vmem:[%s4098_s2 + $0x10] sm:$0xff]  ;;  %v3160_v10 = vld [vmem:[%s4097_s1 + $0x100] sm:$0xff]  ;;  %v1115_v12 = vunpack.c.l.b16 %v972_v7  ;;  %v1116_v13 = vunpack.c.h.b16 %v972_v7 }
  0x40   : > { %1535 = vmatpush.bf16.msra.mxu1 %v3138_v21  ;;  %v1113_v8 = vunpack.c.l.b16 %v971_v4  ;;  %v1114_v9 = vunpack.c.h.b16 %v971_v4  ;;  %v3168_v11 = vld [vmem:[%s4097_s1 + $0x140] sm:$0xff] }
  0x41   : > { %1548 = vmatpush.bf16.msra.mxu2 %v3146_v22  ;;  %v3176_v14 = vld [vmem:[%s4097_s1 + $0x180] sm:$0xff]  ;;  %v1123_v18 = vpack.c.b16 %v1115_v12, %v1115_v12  ;;  %v1124_v19 = vpack.c.b16 %v1116_v13, %v1116_v13 }
  0x42   : > { %1561 = vmatpush.bf16.msra.mxu3 %v3154_v23  ;;  %v3184_v15 = vld [vmem:[%s4097_s1 + $0x1c0] sm:$0xff]  ;;  %v1121_v16 = vpack.c.b16 %v1113_v8, %v1113_v8  ;;  %v1122_v17 = vpack.c.b16 %v1114_v9, %v1114_v9 }
  0x43   : > { %1523 = vmatpush.bf16.msra.mxu0 %v3129_v24  ;;  %v1622_v36 = vld [vmem:[%s4100_s6] sm:$0xf] }
  0x44   : > { %1536 = vmatpush.bf16.msra.mxu1 %v3137_v25 }
  0x45   : > { %1549 = vmatpush.bf16.msra.mxu2 %v3145_v26  ;;  %v3232_v26 = vld [vmem:[%s4099_s28] ss:$0 sm:$0xff] }
  0x46   : > { %1562 = vmatpush.bf16.msra.mxu3 %v3153_v27 }
  0x47   : > { %1524 = vmatpush.bf16.msra.mxu0 %v3128_v30 }
  0x48   : > { %1537 = vmatpush.bf16.msra.mxu1 %v3136_v31 }
  0x49   : > { %1550 = vmatpush.bf16.msra.mxu2 %v3144_v34 }
  0x4a   : > { %1563 = vmatpush.bf16.msra.mxu3 %v3152_v35  ;;  %1525 = vmatmul.bf16.vlgmr.msra.gmra.mxu0 %v1117_v43 }
  0x4b   : > { %1569 = vmatpush.bf16.msrb.mxu0 %v3167_v38  ;;  %1538 = vmatmul.bf16.vlgmr.msra.gmra.mxu1 %v1118_v45 }
  0x4c   : > { %1582 = vmatpush.bf16.msrb.mxu1 %v3175_v39  ;;  %1551 = vmatmul.bf16.vlgmr.msra.gmra.mxu2 %v1119_v42 }
  0x4d   : > { %1595 = vmatpush.bf16.msrb.mxu2 %v3183_v40  ;;  %1564 = vmatmul.bf16.vlgmr.msra.gmra.mxu3 %v1120_v44 }
  0x4e   : > { %1608 = vmatpush.bf16.msrb.mxu3 %v3191_v41  ;;  %v1625_v41 = vrot.slane %v1622_v36, 4 }
  0x4f   : > { %1570 = vmatpush.bf16.msrb.mxu0 %v3166_v46 }
  0x50   : > { %1583 = vmatpush.bf16.msrb.mxu1 %v3174_v47  ;;  %v1621_v47 = vld [vmem:[%s4101_s23] sm:$0x1] }
  0x51   : > { %1596 = vmatpush.bf16.msrb.mxu2 %v3182_v48  ;;  %v3233_v48 = vld [vmem:[%s4101_s23] ss:$0 sm:$0xff] }
  0x52   : > { %1609 = vmatpush.bf16.msrb.mxu3 %v3190_v49 }
  0x53   : > { %1571 = vmatpush.bf16.msrb.mxu0 %v3165_v50 }
  0x54   : > { %1584 = vmatpush.bf16.msrb.mxu1 %v3173_v51 }
  0x55   : > { %1597 = vmatpush.bf16.msrb.mxu2 %v3181_v52 }
  0x56   : > { %1610 = vmatpush.bf16.msrb.mxu3 %v3189_v53 }
  0x57   : > { %1572 = vmatpush.bf16.msrb.mxu0 %v3164_v54 }
  0x58   : > { %1585 = vmatpush.bf16.msrb.mxu1 %v3172_v55 }
  0x59   : > { %1598 = vmatpush.bf16.msrb.mxu2 %v3180_v56 }
  0x5a   : > { %1611 = vmatpush.bf16.msrb.mxu3 %v3188_v57 }
  0x5b   : > { %1573 = vmatpush.bf16.msrb.mxu0 %v3163_v58 }
  0x5c   : > { %1586 = vmatpush.bf16.msrb.mxu1 %v3171_v59 }
  0x5d   : > { %1599 = vmatpush.bf16.msrb.mxu2 %v3179_v60 }
  0x5e   : > { %1612 = vmatpush.bf16.msrb.mxu3 %v3187_v61 }
  0x5f   : > { %1574 = vmatpush.bf16.msrb.mxu0 %v3162_v62 }
  0x60   : > { %1587 = vmatpush.bf16.msrb.mxu1 %v3170_v63 }
  0x61   : > { %1600 = vmatpush.bf16.msrb.mxu2 %v3178_v0 }
  0x62   : > { %1613 = vmatpush.bf16.msrb.mxu3 %v3186_v1 }
  0x63   : > { %1575 = vmatpush.bf16.msrb.mxu0 %v3161_v2 }
  0x64   : > { %1588 = vmatpush.bf16.msrb.mxu1 %v3169_v3 }
  0x65   : > { %1601 = vmatpush.bf16.msrb.mxu2 %v3177_v5 }
  0x66   : > { %1614 = vmatpush.bf16.msrb.mxu3 %v3185_v6 }
  0x67   : > { %1576 = vmatpush.bf16.msrb.mxu0 %v3160_v10 }
  0x68   : > { %1589 = vmatpush.bf16.msrb.mxu1 %v3168_v11 }
  0x69   : > { %1602 = vmatpush.bf16.msrb.mxu2 %v3176_v14 }
  0x6a   : > { %1615 = vmatpush.bf16.msrb.mxu3 %v3184_v15  ;;  %1577 = vmatmul.bf16.vlgmr.msrb.gmra.mxu0 %v1121_v16 }
  0x6b   : > { %1590 = vmatmul.bf16.vlgmr.msrb.gmra.mxu1 %v1122_v17 }
  0x6c   : > { %1603 = vmatmul.bf16.vlgmr.msrb.gmra.mxu2 %v1123_v18 }
  0x6d   : > { %1616 = vmatmul.bf16.vlgmr.msrb.gmra.mxu3 %v1124_v19 }
  0xc7   : > { %v1526_v20 = vpop.f32.mrf.mxu0 }
  0xc8   : > { %v1539_v21 = vpop.f32.mrf.mxu1  ;;  %v1527_v29 = vadd.f32 %v3232_v26, %v1526_v20 }
  0xca   : > { %v1540_v30 = vadd.f32 %v1539_v21, %v1527_v29 }
  0xcf   : > { %v1552_v22 = vpop.f32.mrf.mxu2  ;;  %v1528_v24 = vpop.f32.mrf.mxu0 }
  0xd0   : > { %v1565_v23 = vpop.f32.mrf.mxu3  ;;  %v1541_v25 = vpop.f32.mrf.mxu1  ;;  %v1553_v31 = vadd.f32 %v1552_v22, %v1540_v30 }
  0xd2   : > { %v1566_v32 = vadd.f32 %v1565_v23, %v1553_v31 }
  0xd7   : > { %v1554_v27 = vpop.f32.mrf.mxu2 }
  0xd8   : > { %v1567_v28 = vpop.f32.mrf.mxu3 }
  0xe7   : > { %v1578_v33 = vpop.f32.mrf.mxu0 }
  0xe8   : > { %v1591_v34 = vpop.f32.mrf.mxu1  ;;  %v1579_v35 = vadd.f32 %v1578_v33, %v1566_v32 }
  0xea   : > { %v1592_v37 = vadd.f32 %v1591_v34, %v1579_v35 }
  0xef   : > { %v1604_v38 = vpop.f32.mrf.mxu2  ;;  %v1580_v42 = vpop.f32.mrf.mxu0 }
  0xf0   : > { %v1617_v39 = vpop.f32.mrf.mxu3  ;;  %v1605_v40 = vadd.f32 %v1604_v38, %v1592_v37  ;;  %v1593_v43 = vpop.f32.mrf.mxu1 }
  0xf2   : > { %v1618_v44 = vadd.f32 %v1617_v39, %v1605_v40 }
  0xf4   : > { %v1623_v45 = vadd.f32 %v1622_v36, %v1618_v44  ;;  %v1627_v46 = vadd.f32 %v1625_v41, %v1618_v44 }
  0xf6   : > { %v1629_v49 = vrot.slane %v1623_v45, 7  ;;  %v1635_v50 = vrot.slane %v1627_v46, 6 }
  0xf7   : > { %v1606_v51 = vpop.f32.mrf.mxu2 }
  0xf8   : > { %v1619_v52 = vpop.f32.mrf.mxu3  ;;  %v1638_v53 = vsel %vm1637_vm0, %v1621_v47, %v1629_v49  ;;  %1646 = vst.msk [vmem:[#allocation2 + $0x8] sm:$0x3] %vm1645_vm1, %v1635_v50 }
  0xf9   : > { %v1640_v54 = vsel %vm1639_vm2, %v1638_v53, %v3233_v48 }
  0xfa   : > { %v1642_v55 = vsel %vm1641_vm3, %v1640_v54, %v1635_v50 }
  0xfb   : > { %1644 = vst.msk [vmem:[#allocation2] sm:$0xff] %vm1643_vm4, %v1642_v55 }
  0xfc PF: > { %vm1651_vm5 = vcmask 261120   ;;  %vm1655_vm6 = vcmask 254976   ;;  %v3394_v60 = vmov 32.0   ;;  %v3193_v13 = vld [vmem:[%s3557_s24 + $0x8] sm:$0xff]  ;;  %v3192_v16 = vld [vmem:[%s3557_s24] sm:$0xff]  ;;  %s4104_s25 = sld [smem:[#allocation15_spill]]  ;;  %s4106_s22 = scalar_lea.vmem %s4052_s12, %s3539_s27 }
  0xfd   : > { %3304 = vrcp.f32 %v3394_v60  ;;  %v3195_v14 = vld [vmem:[%s3562_s26 + $0x8] sm:$0xff]  ;;  %1744 = vmatpush.bf16.msra.mxu0 %v3193_v13  ;;  %v3194_v17 = vld [vmem:[%s3562_s26] sm:$0xff]  ;;  %s4107_s24 = sld [smem:[#allocation19_spill]]  ;;  %s3397_s8 = smov 104   ;;  %vm1918_vm14 = vcmask 64512   ;;  %vm2140_vm15 = vcmask 1044480  }
  0xfe   : > { %1778 = vmatpush.bf16.msra.mxu2 %v3195_v14  ;;  %v3197_v20 = vld [vmem:[%s3567_s0 + $0x8] sm:$0xff]  ;;  %v3196_v23 = vld [vmem:[%s3567_s0] sm:$0xff]  ;;  %s4102_s0 = sld [smem:[#allocation14_spill]]  ;;  %vm2029_vm0 = vcmask 80896   ;;  %vm2033_vm1 = vcmask 74752   ;;  %vm2274_vm2 = vcmask 130048   ;;  %s4112_s6 = scalar_lea.vmem %s4057_s17, %s3539_s27 }
  0xff   : > { %v3834_v58 = vld [vmem:[#allocation2 + $0x8] sm:$0x3]  ;;  %v3297_v50 = vld [vmem:[%s4106_s22] ss:$0 sm:$0xff]  ;;  %s4110_s22 = sld [smem:[#allocation13_spill]]  ;;  %vm2277_vm3 = vcmask 195584   ;;  %s4113_s29 = scalar_lea.vmem %s4059_s19, %s3539_s27 }
 0x100   : > { %v1656_v59 = vsel %vm1655_vm6, %v3834_v58, 0.0 }
 0x101   : > { %1745 = vmatpush.bf16.msra.mxu0 %v3192_v16 }
 0x102   : > { %v3830_v56 = vld [vmem:[#allocation2] sm:$0xff]  ;;  %1779 = vmatpush.bf16.msra.mxu2 %v3194_v17  ;;  %s4105_s5 = scalar_lea.vmem %s4104_s25, %s3539_s27 }
 0x103   : > { %v1652_v57 = vsel %vm1651_vm5, %v3830_v56, 0.0  ;;  %v3305_v61 = vpop.eup %3304  ;;  %v3295_v43 = vld [vmem:[%s4105_s5] ss:$0 sm:$0xff]  ;;  %s4108_s26 = scalar_lea.vmem %s4107_s24, %s3539_s27  ;;  %s4109_s5 = scalar_lea.vmem %s4053_s13, %s3539_s27 }
 0x104   : > { %1653 = vadd.xlane.f32.xlu0 %v1652_v57  ;;  %v1660_v62 = vmul.f32 32.0, %v3305_v61  ;;  %vm1664_vm7 = vweird.f32 %v3305_v61  ;;  %s4103_s30 = scalar_lea.vmem %s4102_s0, %s3539_s27  ;;  %v3296_v52 = vld [vmem:[%s4108_s26] ss:$0 sm:$0xff]  ;;  %s3395_s0 = smov 112  }
 0x105   : > { %v3294_v38 = vld [vmem:[%s4103_s30] ss:$0 sm:$0xff]  ;;  %s3396_s30 = smov 120   ;;  %s3398_s24 = smov 8  }
 0x106   : > { %v1661_v63 = vsub.f32 1.0, %v1660_v62  ;;  %1812 = vmatpush.bf16.msrb.mxu2 %v3197_v20  ;;  %s3399_s26 = smov 16  }
 0x108   : > { %v1662_v0 = vmul.f32 %v3305_v61, %v1661_v63 }
 0x10a   : > { %v1663_v1 = vadd.f32 %v3305_v61, %v1662_v0  ;;  %1813 = vmatpush.bf16.msrb.mxu2 %v3196_v23 }
 0x10c   : > { %1657 = vadd.xlane.f32.xlu0 %v1656_v59  ;;  %v3838_v2 = vsel %vm1664_vm7, %v3305_v61, %v1663_v1 }
 0x177   : > { %v1654_v3 = vpop.xlane.xlu0 %1653 }
 0x178   : > { %v1666_v4 = vmul.f32 %v3838_v2, %v1654_v3 }
 0x17a   : > { %v1668_v5 = vsub.f32 %v3830_v56, %v1666_v4 }
 0x17c   : > { %v1670_v6 = vmul.f32 %v1668_v5, %v1668_v5 }
 0x17e   : > { %v1672_v7 = vsel %vm1651_vm5, %v1670_v6, 0.0 }
 0x17f   : > { %1673 = vadd.xlane.f32.xlu1 %v1672_v7  ;;  %v1658_v8 = vpop.xlane.xlu0 %1657  ;;  %v3298_v7 = vld [vmem:[%s4109_s5] ss:$0 sm:$0xff] }
 0x180   : > { %v1667_v9 = vmul.f32 %v3838_v2, %v1658_v8 }
 0x182   : > { %v1669_v10 = vsub.f32 %v3834_v58, %v1667_v9 }
 0x184   : > { %v1671_v11 = vmul.f32 %v1669_v10, %v1669_v10 }
 0x186   : > { %v1675_v12 = vsel %vm1655_vm6, %v1671_v11, 0.0 }
 0x187   : > { %1676 = vadd.xlane.f32.xlu1 %v1675_v12 }
 0x1f2   : > { %v1674_v15 = vpop.xlane.xlu1 %1673 }
 0x1f3   : > { %v1678_v18 = vmul.f32 %v1674_v15, %v3838_v2 }
 0x1f5   : > { %v1680_v19 = vadd.f32 1e-06, %v1678_v18 }
 0x1f7   : > { %3306 = vrsqrt.f32 %v1680_v19  ;;  %vm1688_vm9 = vweird.f32 %v1680_v19 }
 0x1fa   : > { %v1677_v21 = vpop.xlane.xlu1 %1676 }
 0x1fb   : > { %v1679_v22 = vmul.f32 %v1677_v21, %v3838_v2 }
 0x1fd   : > { %v3307_v24 = vpop.eup %3306  ;;  %v1681_v25 = vadd.f32 1e-06, %v1679_v22 }
 0x1fe   : > { %v1683_v26 = vmul.f32 %v3307_v24, %v1680_v19  ;;  %vm1689_vm8 = vweird.f32 %v3307_v24 }
 0x1ff   : > { %3308 = vrsqrt.f32 %v1681_v25  ;;  %vm1690_vm10 = vmor %vm1688_vm9, %vm1689_vm8  ;;  %vm1698_vm12 = vweird.f32 %v1681_v25 }
 0x200   : > { %v1684_v27 = vmul.f32 %v3307_v24, %v1683_v26 }
 0x202   : > { %v1685_v28 = vmul.f32 0.5, %v1684_v27 }
 0x204   : > { %v1686_v29 = vsub.f32 1.5, %v1685_v28 }
 0x205   : > { %v3309_v30 = vpop.eup %3308 }
 0x206   : > { %v1687_v31 = vmul.f32 %v3307_v24, %v1686_v29  ;;  %v1693_v32 = vmul.f32 %v3309_v30, %v1681_v25  ;;  %vm1699_vm11 = vweird.f32 %v3309_v30 }
 0x207   : > { %vm1700_vm13 = vmor %vm1698_vm12, %vm1699_vm11 }
 0x208   : > { %v1694_v33 = vmul.f32 %v3309_v30, %v1693_v32  ;;  %v1691_v34 = vsel %vm1690_vm10, %v3307_v24, %v1687_v31 }
 0x209   : > { %v1702_v37 = vmul.f32 %v1691_v34, %v1668_v5 }
 0x20a   : > { %v1695_v35 = vmul.f32 0.5, %v1694_v33 }
 0x20b   : > { %v1707_v42 = vmul.f32 %v3294_v38, %v1702_v37 }
 0x20c   : > { %v1696_v36 = vsub.f32 1.5, %v1695_v35 }
 0x20d   : > { %v1712_v45 = vadd.f32 %v3295_v43, %v1707_v42 }
 0x20e   : > { %v1697_v39 = vmul.f32 %v3309_v30, %v1696_v36 }
 0x210   : > { %v1701_v40 = vsel %vm1700_vm13, %v3309_v30, %v1697_v39 }
 0x211   : > { %v1703_v41 = vmul.f32 %v1701_v40, %v1669_v10 }
 0x213   : > { %v1708_v44 = vmul.f32 %v3294_v38, %v1703_v41 }
 0x215   : > { %v1713_v46 = vadd.f32 %v3295_v43, %v1708_v44 }
 0x217   : > { %v1714_v47 = vpack.c.bf16 %v1713_v46, %v1712_v45 }
 0x219   : > { %3040 = vmatmul.msk.bf16.vlgmr.msra.gmra.mxu0 %vm1651_vm5, %v1714_v47  ;;  %3049 = vmatmul.msk.bf16.vlgmr.msra.gmra.mxu2 %vm1651_vm5, %v1714_v47 }
 0x229   : > { %3058 = vmatmul.msk.bf16.vlgmr.msrb.gmra.mxu2 %vm1651_vm5, %v1714_v47 }
 0x296   : > { %v1747_v48 = vpop.f32.mrf.mxu0 }
 0x297   : > { %v1748_v57 = vadd.f32 %v3296_v52, %v1747_v48 }
 0x299   : > { %v1820_v0 = vmul.f32 0.35355338, %v1748_v57 }
 0x29b   : > { %v1842_v9 = vpack.c.bf16 %v1820_v0, %v1820_v0 }
 0x29c   : > { %v1781_v49 = vpop.f32.mrf.mxu2 }
 0x29d   : > { %v1782_v53 = vadd.f32 %v3297_v50, %v1781_v49  ;;  %v1910_v13 = vunpack.c.l.b16 %v1842_v9 }
 0x29e   : > { %v1749_v51 = vpop.f32.mrf.mxu0 }
 0x29f   : > { %v1750_v54 = vadd.f32 %v3296_v52, %v1749_v51  ;;  %v1870_v60 = vpack.c.bf16 %v1782_v53, %v1782_v53 }
 0x2a1   : > { %v1821_v61 = vmul.f32 0.35355338, %v1750_v54  ;;  %v1915_v1 = vunpack.c.l.b16 %v1870_v60 }
 0x2a3   : > { %v1843_v5 = vpack.c.bf16 %v1821_v61, %v1821_v61  ;;  %v3239_v11 = vpack.i.bf16 %v1821_v61, %v1820_v0 }
 0x2a4   : > { %v1783_v55 = vpop.f32.mrf.mxu2 }
 0x2a5   : > { %v1784_v59 = vadd.f32 %v3297_v50, %v1783_v55  ;;  %v1911_v10 = vunpack.c.l.b16 %v1843_v5 }
 0x2a7   : > { %v3249_v62 = vpack.i.bf16 %v1784_v59, %v1782_v53  ;;  %v1871_v63 = vpack.c.bf16 %v1784_v59, %v1784_v59  ;;  %v1912_v14 = vpack.c.b16 %v1911_v10, %v1910_v13 }
 0x2a9   : > { %3250 = vrot.lane.b32.xlu1 %v3249_v62, %s3395_s0  ;;  %3245 = vrot.lane.b32.xlu0 %v3249_v62, %s3396_s30  ;;  %v1916_v3 = vunpack.c.l.b16 %v1871_v63 }
 0x2aa   : > { %3235 = vrot.lane.b32.xlu2 %v3249_v62, %s3397_s8 }
 0x2ab   : > { %v1917_v4 = vpack.c.b16 %v1916_v3, %v1915_v1 }
 0x2ac   : > { %v1815_v6 = vpop.f32.mrf.mxu2 }
 0x2ad   : > { %v1923_v8 = vsel %vm1918_vm14, %v1917_v4, 0  ;;  %v1816_v12 = vadd.f32 %v3298_v7, %v1815_v6 }
 0x2ae   : > { %1932 = vmatpush.bf16.xpose.msra.mxu3 %v1923_v8 }
 0x2af   : > { %v1898_v17 = vpack.c.bf16 %v1816_v12, %v1816_v12 }
 0x2b1   : > { %v2134_v20 = vunpack.c.l.b16 %v1898_v17 }
 0x2b2   : > { %3240 = vrot.lane.b32.xlu2 %v3239_v11, %s3397_s8 }
 0x2b4   : > { %v1817_v15 = vpop.f32.mrf.mxu2 }
 0x2b5   : > { %v1818_v16 = vadd.f32 %v3298_v7, %v1817_v15  ;;  %3059 = vmatmul.msk.bf16.vlgmr.msra.gmra.mxu3 %vm1918_vm14, %v1912_v14  ;;  %v1906_v14 = vld [vmem:[%s4110_s22] sm:$0xff] }
 0x2b7   : > { %v1899_v18 = vpack.c.bf16 %v1818_v16, %v1818_v16  ;;  %v3888_v19 = vpack.i.bf16 %v1818_v16, %v1816_v12 }
 0x2b9   : > { %v2135_v21 = vunpack.c.l.b16 %v1899_v18 }
 0x2ba   : > { %3255 = vrot.lane.b32.xlu2 %v3239_v11, %s3396_s30 }
 0x2bb   : > { %v2136_v22 = vpack.c.b16 %v2135_v21, %v2134_v20 }
 0x2bd   : > { %v2142_v23 = vsel %vm2140_vm15, %v2136_v22, 0 }
 0x2be   : > { %2151 = vmatpush.bf16.msrb.mxu3 %v2142_v23 }
 0x2c2   : > { %3260 = vrot.lane.b32.xlu2 %v3239_v11, %s3395_s0 }
 0x304   : > { %v3236_v24 = vpop.permute.xlu2 %3235 }
 0x305   : > { %v3238_v25 = vunpack.i.h.bf16 %v3236_v24  ;;  %v3237_v26 = vunpack.i.l.bf16 %v3236_v24 }
 0x307   : > { %v1877_v27 = vpack.c.bf16 %v3238_v25, %v3238_v25  ;;  %v1876_v28 = vpack.c.bf16 %v3237_v26, %v3237_v26 }
 0x309   : > { %v2007_v29 = vunpack.c.l.b16 %v1877_v27  ;;  %v2006_v30 = vunpack.c.l.b16 %v1876_v28 }
 0x30b   : > { %v2008_v31 = vpack.c.b16 %v2007_v29, %v2006_v30  ;;  %v1907_v29 = vld [vmem:[%s4110_s22 + $0x8] sm:$0x3] }
 0x30c   : > { %v3241_v32 = vpop.permute.xlu2 %3240 }
 0x30d   : > { %v3243_v33 = vunpack.i.h.bf16 %v3241_v32  ;;  %v3242_v34 = vunpack.i.l.bf16 %v3241_v32  ;;  %v2013_v35 = vsel %vm1918_vm14, %v2008_v31, 0 }
 0x30e   : > { %2022 = vmatpush.bf16.xpose.msra.mxu2 %v2013_v35 }
 0x30f   : > { %v1849_v36 = vpack.c.bf16 %v3243_v33, %v3243_v33  ;;  %v1848_v37 = vpack.c.bf16 %v3242_v34, %v3242_v34 }
 0x311   : > { %v2002_v38 = vunpack.c.l.b16 %v1849_v36  ;;  %v2001_v39 = vunpack.c.l.b16 %v1848_v37 }
 0x313   : > { %v2003_v40 = vpack.c.b16 %v2002_v38, %v2001_v39 }
 0x314   : > { %v3256_v41 = vpop.permute.xlu2 %3255 }
 0x315   : > { %3062 = vmatmul.msk.bf16.vlgmr.msra.gmra.mxu2 %vm1918_vm14, %v2003_v40  ;;  %v3258_v49 = vunpack.i.h.bf16 %v3256_v41  ;;  %v3257_v50 = vunpack.i.l.bf16 %v3256_v41 }
 0x317   : > { %v1845_v63 = vpack.c.bf16 %v3258_v49, %v3258_v49  ;;  %v1844_v0 = vpack.c.bf16 %v3257_v50, %v3257_v50 }
 0x319   : > { %v1942_v8 = vunpack.c.l.b16 %v1845_v63  ;;  %v1941_v9 = vunpack.c.l.b16 %v1844_v0 }
 0x31b   : > { %v3251_v42 = vpop.permute.xlu1 %3250  ;;  %v3246_v43 = vpop.permute.xlu0 %3245  ;;  %v1943_v12 = vpack.c.b16 %v1942_v8, %v1941_v9 }
 0x31c   : > { %v3253_v44 = vunpack.i.h.bf16 %v3251_v42  ;;  %v3252_v45 = vunpack.i.l.bf16 %v3251_v42  ;;  %v3248_v46 = vunpack.i.h.bf16 %v3246_v43  ;;  %v3247_v47 = vunpack.i.l.bf16 %v3246_v43  ;;  %v3261_v48 = vpop.permute.xlu2 %3260 }
 0x31d   : > { %v3263_v51 = vunpack.i.h.bf16 %v3261_v48  ;;  %v3262_v52 = vunpack.i.l.bf16 %v3261_v48 }
 0x31e   : > { %v1875_v53 = vpack.c.bf16 %v3253_v44, %v3253_v44  ;;  %v1874_v54 = vpack.c.bf16 %v3252_v45, %v3252_v45  ;;  %v1873_v55 = vpack.c.bf16 %v3248_v46, %v3248_v46  ;;  %v1872_v57 = vpack.c.bf16 %v3247_v47, %v3247_v47 }
 0x31f   : > { %v1847_v1 = vpack.c.bf16 %v3263_v51, %v3263_v51  ;;  %v1846_v3 = vpack.c.bf16 %v3262_v52, %v3262_v52 }
 0x320   : > { %v1977_v59 = vunpack.c.l.b16 %v1875_v53  ;;  %v1976_v60 = vunpack.c.l.b16 %v1874_v54  ;;  %v1947_v61 = vunpack.c.l.b16 %v1873_v55  ;;  %v1946_v62 = vunpack.c.l.b16 %v1872_v57 }
 0x321   : > { %v1972_v10 = vunpack.c.l.b16 %v1847_v1  ;;  %v1971_v11 = vunpack.c.l.b16 %v1846_v3 }
 0x322   : > { %v1948_v4 = vpack.c.b16 %v1947_v61, %v1946_v62  ;;  %v1978_v5 = vpack.c.b16 %v1977_v59, %v1976_v60 }
 0x323   : > { %v1973_v13 = vpack.c.b16 %v1972_v10, %v1971_v11 }
 0x324   : > { %v1953_v6 = vsel %vm1918_vm14, %v1948_v4, 0  ;;  %v1983_v7 = vsel %vm1918_vm14, %v1978_v5, 0 }
 0x325   : > { %1962 = vmatpush.bf16.xpose.msrb.mxu0 %v1953_v6  ;;  %1992 = vmatpush.bf16.xpose.msra.mxu1 %v1983_v7 }
 0x32c   : > { %3060 = vmatmul.msk.bf16.vlgmr.msrb.gmra.mxu0 %vm1918_vm14, %v1943_v12  ;;  %3061 = vmatmul.msk.bf16.vlgmr.msra.gmra.mxu1 %vm1918_vm14, %v1973_v13 }
 0x338   : > { %v1934_v15 = vpop.f32.mrf.mxu3 }
 0x339   : > { %v3902_v16 = vadd.f32 %v1934_v15, %v1906_v14 }
 0x33b   : > { %v2030_v17 = vsel %vm2029_vm0, %v3902_v16, -inf }
 0x33c   : > { %2031 = vmax.xlane.f32.xlu1 %v2030_v17 }
 0x340   : > { %v1936_v35 = vpop.f32.mrf.mxu3 }
 0x341   : > { %v1937_v37 = vadd.f32 %v1936_v35, %v1907_v29 }
 0x343   : > { %v2034_v40 = vsel %vm2033_vm1, %v1937_v37, -inf }
 0x398   : > { %v2024_v18 = vpop.f32.mrf.mxu2 }
 0x399   : > { %v2025_v20 = vadd.f32 %v2024_v18, %v1906_v14 }
 0x39b   : > { %v2049_v21 = vsel %vm2029_vm0, %v2025_v20, -inf }
 0x39c   : > { %2050 = vmax.xlane.f32.xlu2 %v2049_v21 }
 0x3a0   : > { %v2026_v28 = vpop.f32.mrf.mxu2 }
 0x3a1   : > { %v2027_v30 = vadd.f32 %v2026_v28, %v1907_v29 }
 0x3a3   : > { %v2052_v33 = vsel %vm2033_vm1, %v2027_v30, -inf }
 0x3a9   : > { %v1964_v22 = vpop.f32.mrf.mxu0  ;;  %v1994_v23 = vpop.f32.mrf.mxu1 }
 0x3aa   : > { %v1965_v24 = vadd.f32 %v1964_v22, %v1906_v14  ;;  %v1995_v25 = vadd.f32 %v1994_v23, %v1906_v14 }
 0x3ac   : > { %v2043_v26 = vsel %vm2029_vm0, %v1995_v25, -inf  ;;  %v2037_v27 = vsel %vm2029_vm0, %v1965_v24, -inf }
 0x3ad   : > { %2044 = vmax.xlane.f32.xlu0 %v2043_v26  ;;  %2038 = vmax.xlane.f32.xlu1 %v2037_v27 }
 0x3af   : > { %v2032_v44 = vpop.xlane.xlu1 %2031 }
 0x3b0   : > { %v2055_v11 = vsub.f32 %v3902_v16, %v2032_v44 }
 0x3b1   : > { %v1966_v31 = vpop.f32.mrf.mxu0  ;;  %v1996_v36 = vpop.f32.mrf.mxu1 }
 0x3b2   : > { %v1967_v32 = vadd.f32 %v1966_v31, %v1907_v29  ;;  %v1997_v38 = vadd.f32 %v1996_v36, %v1907_v29  ;;  %v2063_v13 = vmul.f32 1.442695, %v2055_v11 }
 0x3b4   : > { %v2040_v34 = vsel %vm2033_vm1, %v1967_v32, -inf  ;;  %v2046_v39 = vsel %vm2033_vm1, %v1997_v38, -inf }
 0x3b5   : > { %2053 = vmax.xlane.f32.xlu0 %v2052_v33  ;;  %2041 = vmax.xlane.f32.xlu2 %v2040_v34 }
 0x3bd   : > { %2047 = vmax.xlane.f32.xlu2 %v2046_v39  ;;  %2035 = vmax.xlane.f32.xlu0 %v2034_v40 }
 0x40f   : > { %v2051_v41 = vpop.xlane.xlu2 %2050 }
 0x410   : > { %v2061_v42 = vsub.f32 %v2025_v20, %v2051_v41 }
 0x412   : > { %v2075_v43 = vmul.f32 1.442695, %v2061_v42 }
 0x414   : > { %3310 = vpow2.f32 %v2075_v43 }
 0x41a   : > { %v3916_v45 = vpop.eup %3310 }
 0x41b   : > { %v2097_v46 = vsel %vm2029_vm0, %v3916_v45, 0.0 }
 0x41c   : > { %2098 = vadd.xlane.f32.xlu2 %v2097_v46 }
 0x420   : > { %v2045_v47 = vpop.xlane.xlu0 %2044  ;;  %v2039_v48 = vpop.xlane.xlu1 %2038 }
 0x421   : > { %v2059_v49 = vsub.f32 %v1995_v25, %v2045_v47  ;;  %v2057_v50 = vsub.f32 %v1965_v24, %v2039_v48 }
 0x423   : > { %v2071_v51 = vmul.f32 1.442695, %v2059_v49  ;;  %v2067_v52 = vmul.f32 1.442695, %v2057_v50 }
 0x425   : > { %3312 = vpow2.f32 %v2071_v51 }
 0x426   : > { %3314 = vpow2.f32 %v2067_v52 }
 0x428   : > { %v2054_v53 = vpop.xlane.xlu0 %2053  ;;  %v2042_v54 = vpop.xlane.xlu2 %2041 }
 0x429   : > { %v2062_v55 = vsub.f32 %v2027_v30, %v2054_v53  ;;  %v2058_v57 = vsub.f32 %v1967_v32, %v2042_v54 }
 0x42b   : > { %v3920_v59 = vpop.eup %3312  ;;  %v2077_v60 = vmul.f32 1.442695, %v2062_v55  ;;  %v2069_v61 = vmul.f32 1.442695, %v2058_v57 }
 0x42c   : > { %v3922_v62 = vpop.eup %3314  ;;  %v2091_v63 = vsel %vm2029_vm0, %v3920_v59, 0.0 }
 0x42d   : > { %3316 = vpow2.f32 %v2077_v60  ;;  %2092 = vadd.xlane.f32.xlu1 %v2091_v63  ;;  %v2085_v0 = vsel %vm2029_vm0, %v3922_v62, 0.0 }
 0x42e   : > { %3318 = vpow2.f32 %v2069_v61  ;;  %2086 = vadd.xlane.f32.xlu0 %v2085_v0 }
 0x430   : > { %v2048_v1 = vpop.xlane.xlu2 %2047  ;;  %v2036_v12 = vpop.xlane.xlu0 %2035 }
 0x431   : > { %v2060_v3 = vsub.f32 %v1997_v38, %v2048_v1  ;;  %v2056_v14 = vsub.f32 %v1937_v37, %v2036_v12 }
 0x433   : > { %v3317_v4 = vpop.eup %3316  ;;  %v2073_v5 = vmul.f32 1.442695, %v2060_v3  ;;  %v2065_v15 = vmul.f32 1.442695, %v2056_v14 }
 0x434   : > { %v3319_v6 = vpop.eup %3318  ;;  %v2100_v7 = vsel %vm2033_vm1, %v3317_v4, 0.0 }
 0x435   : > { %3320 = vpow2.f32 %v2073_v5  ;;  %v2088_v8 = vsel %vm2033_vm1, %v3319_v6, 0.0  ;;  %2101 = vadd.xlane.f32.xlu1 %v2100_v7 }
 0x436   : > { %2089 = vadd.xlane.f32.xlu2 %v2088_v8  ;;  %3322 = vpow2.f32 %v2063_v13 }
 0x437   : > { %3324 = vpow2.f32 %v2065_v15 }
 0x43b   : > { %v3321_v9 = vpop.eup %3320 }
 0x43c   : > { %v2094_v10 = vsel %vm2033_vm1, %v3321_v9, 0.0  ;;  %v3938_v17 = vpop.eup %3322 }
 0x43d   : > { %2095 = vadd.xlane.f32.xlu0 %v2094_v10  ;;  %v2079_v18 = vsel %vm2029_vm0, %v3938_v17, 0.0  ;;  %v3942_v20 = vpop.eup %3324 }
 0x43e   : > { %v2082_v21 = vsel %vm2033_vm1, %v3942_v20, 0.0 }
 0x44e   : > { %3265 = vrot.lane.b32.xlu2 %v3888_v19, %s3397_s8  ;;  %3270 = vrot.lane.b32.xlu1 %v3888_v19, %s3396_s30  ;;  %s4111_s8 = scalar_lea.vmem %s4055_s15, %s3539_s27 }
 0x451   : > { %3275 = vrot.lane.b32.xlu0 %v3888_v19, %s3395_s0  ;;  %s3400_s0 = smov 24  }
 0x477   : > { %2080 = vadd.xlane.f32.xlu2 %v2079_v18 }
 0x47b   : > { %2083 = vadd.xlane.f32.xlu0 %v2082_v21 }
 0x48f   : > { %v2099_v16 = vpop.xlane.xlu2 %2098 }
 0x490   : > { %3326 = vrcp.f32 %v2099_v16 }
 0x496   : > { %v3327_v24 = vpop.eup %3326 }
 0x497   : > { %v2117_v29 = vmul.f32 %v3327_v24, %v3916_v45 }
 0x499   : > { %v2125_v35 = vpack.c.bf16 %v2117_v29, %v2117_v29 }
 0x49b   : > { %v2220_v41 = vunpack.c.l.b16 %v2125_v35 }
 0x4a0   : > { %v2093_v19 = vpop.xlane.xlu1 %2092 }
 0x4a1   : > { %v2087_v25 = vpop.xlane.xlu0 %2086 }
 0x4a8   : > { %v2102_v22 = vpop.xlane.xlu1 %2101 }
 0x4a9   : > { %v2090_v23 = vpop.xlane.xlu2 %2089  ;;  %3328 = vrcp.f32 %v2102_v22 }
 0x4aa   : > { %3330 = vrcp.f32 %v2090_v23 }
 0x4ab   : > { %3332 = vrcp.f32 %v2087_v25 }
 0x4af   : > { %v3329_v26 = vpop.eup %3328 }
 0x4b0   : > { %v2118_v27 = vmul.f32 %v3329_v26, %v3317_v4  ;;  %v2096_v38 = vpop.xlane.xlu0 %2095  ;;  %v3331_v43 = vpop.eup %3330 }
 0x4b1   : > { %v3266_v28 = vpop.permute.xlu2 %3265  ;;  %3334 = vrcp.f32 %v2096_v38  ;;  %v3333_v45 = vpop.eup %3332  ;;  %v2114_v47 = vmul.f32 %v3331_v43, %v3319_v6 }
 0x4b2   : > { %v3268_v30 = vunpack.i.h.bf16 %v3266_v28  ;;  %v3267_v31 = vunpack.i.l.bf16 %v3266_v28  ;;  %v2126_v32 = vpack.c.bf16 %v2118_v27, %v2118_v27  ;;  %3336 = vrcp.f32 %v2093_v19 }
 0x4b3   : > { %v2113_v50 = vmul.f32 %v3333_v45, %v3922_v62  ;;  %v2122_v54 = vpack.c.bf16 %v2114_v47, %v2114_v47 }
 0x4b4   : > { %v1905_v33 = vpack.c.bf16 %v3268_v30, %v3268_v30  ;;  %v1904_v34 = vpack.c.bf16 %v3267_v31, %v3267_v31  ;;  %v2221_v39 = vunpack.c.l.b16 %v2126_v32 }
 0x4b5   : > { %v2121_v1 = vpack.c.bf16 %v2113_v50, %v2113_v50  ;;  %v2161_v8 = vunpack.c.l.b16 %v2122_v54 }
 0x4b6   : > { %v2226_v36 = vunpack.c.l.b16 %v1905_v33  ;;  %v2225_v37 = vunpack.c.l.b16 %v1904_v34  ;;  %v2222_v44 = vpack.c.b16 %v2221_v39, %v2220_v41  ;;  %v3199_v39 = vld [vmem:[%s3580_s3 + $0x8] sm:$0xff] }
 0x4b7   : > { %v3335_v46 = vpop.eup %3334  ;;  %2310 = vmatpush.bf16.msra.mxu3 %v3199_v39  ;;  %v3301_v39 = vld [vmem:[%s4112_s6] ss:$0 sm:$0xff] }
 0x4b8   : > { %v2227_v40 = vpack.c.b16 %v2226_v36, %v2225_v37  ;;  %v3337_v49 = vpop.eup %3336  ;;  %v2116_v53 = vmul.f32 %v3335_v46, %v3321_v9  ;;  %v2160_v9 = vunpack.c.l.b16 %v2121_v1 }
 0x4b9   : > { %v2115_v61 = vmul.f32 %v3337_v49, %v3920_v59 }
 0x4ba   : > { %v2232_v42 = vsel %vm2140_vm15, %v2227_v40, 0  ;;  %v2124_v5 = vpack.c.bf16 %v2116_v53, %v2116_v53  ;;  %v2162_v59 = vpack.c.b16 %v2161_v8, %v2160_v9  ;;  %v3198_v40 = vld [vmem:[%s3580_s3] sm:$0xff] }
 0x4bb   : > { %2241 = vmatpush.bf16.msrb.mxu2 %v2232_v42  ;;  %v2123_v62 = vpack.c.bf16 %v2115_v61, %v2115_v61  ;;  %2311 = vmatpush.bf16.msra.mxu3 %v3198_v40 }
 0x4bc   : > { %v2191_v14 = vunpack.c.l.b16 %v2124_v5 }
 0x4bd   : > { %v2190_v18 = vunpack.c.l.b16 %v2123_v62 }
 0x4be   : > { %3066 = vmatmul.msk.bf16.vlgmr.msrb.gmra.mxu2 %vm2029_vm0, %v2222_v44 }
 0x4bf   : > { %v2192_v19 = vpack.c.b16 %v2191_v14, %v2190_v18 }
 0x4c0   : > { %v3271_v48 = vpop.permute.xlu1 %3270 }
 0x4c1   : > { %v3273_v51 = vunpack.i.h.bf16 %v3271_v48  ;;  %v3272_v52 = vunpack.i.l.bf16 %v3271_v48 }
 0x4c3   : > { %v1901_v55 = vpack.c.bf16 %v3273_v51, %v3273_v51  ;;  %v1900_v57 = vpack.c.bf16 %v3272_v52, %v3272_v52  ;;  %v3276_v60 = vpop.permute.xlu0 %3275 }
 0x4c4   : > { %v3278_v63 = vunpack.i.h.bf16 %v3276_v60  ;;  %v3277_v0 = vunpack.i.l.bf16 %v3276_v60 }
 0x4c5   : > { %v2166_v3 = vunpack.c.l.b16 %v1901_v55  ;;  %v2165_v4 = vunpack.c.l.b16 %v1900_v57 }
 0x4c6   : > { %v1903_v6 = vpack.c.bf16 %v3278_v63, %v3278_v63  ;;  %v1902_v7 = vpack.c.bf16 %v3277_v0, %v3277_v0  ;;  %v3299_v63 = vld [vmem:[%s4111_s8] ss:$0 sm:$0xff] }
 0x4c7   : > { %v2167_v10 = vpack.c.b16 %v2166_v3, %v2165_v4 }
 0x4c8   : > { %v2196_v11 = vunpack.c.l.b16 %v1903_v6  ;;  %v2195_v12 = vunpack.c.l.b16 %v1902_v7 }
 0x4c9   : > { %v2172_v13 = vsel %vm2140_vm15, %v2167_v10, 0 }
 0x4ca   : > { %2181 = vmatpush.bf16.msra.mxu0 %v2172_v13  ;;  %v2197_v15 = vpack.c.b16 %v2196_v11, %v2195_v12 }
 0x4cc   : > { %v2202_v21 = vsel %vm2140_vm15, %v2197_v15, 0 }
 0x4cd   : > { %3064 = vmatmul.msk.bf16.vlgmr.msra.gmra.mxu0 %vm2029_vm0, %v2162_v59  ;;  %2211 = vmatpush.bf16.msrb.mxu1 %v2202_v21  ;;  %v3201_v59 = vld [vmem:[%s3597_s4 + $0x8] sm:$0xff] }
 0x4ce   : > { %2406 = vmatpush.bf16.msrb.mxu0 %v3201_v59 }
 0x4d0   : > { %3065 = vmatmul.msk.bf16.vlgmr.msrb.gmra.mxu1 %vm2029_vm0, %v2192_v19 }
 0x4ea   : > { %v2081_v16 = vpop.xlane.xlu2 %2080 }
 0x4eb   : > { %3338 = vrcp.f32 %v2081_v16  ;;  %v3200_v16 = vld [vmem:[%s3597_s4] sm:$0xff] }
 0x4ec   : > { %2407 = vmatpush.bf16.msrb.mxu0 %v3200_v16 }
 0x4ee   : > { %v2084_v22 = vpop.xlane.xlu0 %2083 }
 0x4ef   : > { %3340 = vrcp.f32 %v2084_v22 }
 0x4f1   : > { %v3339_v23 = vpop.eup %3338 }
 0x4f2   : > { %v2111_v24 = vmul.f32 %v3339_v23, %v3938_v17 }
 0x4f4   : > { %v2119_v26 = vpack.c.bf16 %v2111_v24, %v2111_v24 }
 0x4f5   : > { %v3341_v25 = vpop.eup %3340 }
 0x4f6   : > { %v2112_v27 = vmul.f32 %v3341_v25, %v3942_v20  ;;  %v2129_v29 = vunpack.c.l.b16 %v2119_v26 }
 0x4f8   : > { %v2120_v28 = vpack.c.bf16 %v2112_v27, %v2112_v27 }
 0x4fa   : > { %v2130_v30 = vunpack.c.l.b16 %v2120_v28 }
 0x4fc   : > { %v2131_v31 = vpack.c.b16 %v2130_v30, %v2129_v29 }
 0x4fe   : > { %3063 = vmatmul.msk.bf16.vlgmr.msrb.gmra.mxu3 %vm2029_vm0, %v2131_v31 }
 0x541   : > { %v2243_v36 = vpop.f32.mrf.mxu2 }
 0x549   : > { %v2245_v20 = vpop.f32.mrf.mxu2 }
 0x54a   : > { %v2183_v32 = vpop.f32.mrf.mxu0  ;;  %v3289_v38 = vpack.i.bf16 %v2245_v20, %v2243_v36 }
 0x54d   : > { %v2213_v33 = vpop.f32.mrf.mxu1 }
 0x552   : > { %v2185_v34 = vpop.f32.mrf.mxu0 }
 0x553   : > { %v3279_v35 = vpack.i.bf16 %v2185_v34, %v2183_v32 }
 0x555   : > { %3280 = vrot.lane.b32.xlu1 %v3279_v35, %s3398_s24  ;;  %v2215_v17 = vpop.f32.mrf.mxu1  ;;  %s4114_s24 = sld [smem:[#allocation7_spill]] }
 0x556   : > { %v3284_v37 = vpack.i.bf16 %v2215_v17, %v2213_v33  ;;  %v3300_v17 = vld [vmem:[%s944_s10] ss:$0 sm:$0xff] }
 0x55b   : > { %p3117_p5 = scmp.ne.s32.totalorder %s4114_s24, 1 }
 0x55c   : > { %s4116_s30 = sld [smem:[#allocation22_spill]] (!%p3117_p5) }
 0x55d   : > { %3285 = vrot.lane.b32.xlu1 %v3284_v37, %s3399_s26  ;;  %s4115_s26 = sld [smem:[#allocation21_spill]] (!%p3117_p5) }
 0x565   : > { %3290 = vrot.lane.b32.xlu1 %v3289_v38, %s3400_s0 }
 0x581   : > { %v2153_v42 = vpop.f32.mrf.mxu3 }
 0x589   : > { %v2155_v48 = vpop.f32.mrf.mxu3 }
 0x5c7   : > { %v3281_v41 = vpop.permute.xlu1 %3280 }
 0x5c8   : > { %v3283_v44 = vunpack.i.h.bf16 %v3281_v41  ;;  %v3282_v45 = vunpack.i.l.bf16 %v3281_v41 }
 0x5ca   : > { %v2273_v50 = vsel %vm1918_vm14, %v2155_v48, %v3283_v44  ;;  %v2272_v51 = vsel %vm1918_vm14, %v2153_v42, %v3282_v45  ;;  %v3207_v48 = vld [vmem:[%s3607_s9 + $0x28] sm:$0xff] }
 0x5cf   : > { %v3286_v43 = vpop.permute.xlu1 %3285 }
 0x5d0   : > { %v3288_v46 = vunpack.i.h.bf16 %v3286_v43  ;;  %v3287_v47 = vunpack.i.l.bf16 %v3286_v43 }
 0x5d2   : > { %v2275_v54 = vsel %vm2274_vm2, %v2272_v51, %v3287_v47  ;;  %v2276_v55 = vsel %vm2274_vm2, %v2273_v50, %v3288_v46  ;;  %v3209_v46 = vld [vmem:[%s3607_s9 + $0x38] sm:$0xff]  ;;  %v3208_v47 = vld [vmem:[%s3607_s9 + $0x30] sm:$0xff] }
 0x5d3   : > { %2501 = vmatpush.bf16.msra.mxu1 %v3209_v46  ;;  %v3205_v50 = vld [vmem:[%s3607_s9 + $0x18] sm:$0xff]  ;;  %v3204_v51 = vld [vmem:[%s3607_s9 + $0x10] sm:$0xff] }
 0x5d7   : > { %v3291_v49 = vpop.permute.xlu1 %3290  ;;  %2502 = vmatpush.bf16.msra.mxu1 %v3208_v47 }
 0x5d8   : > { %v3293_v52 = vunpack.i.h.bf16 %v3291_v49  ;;  %v3292_v53 = vunpack.i.l.bf16 %v3291_v49  ;;  %v3206_v49 = vld [vmem:[%s3607_s9 + $0x20] sm:$0xff] }
 0x5da   : > { %v2278_v57 = vsel %vm2277_vm3, %v2275_v54, %v3292_v53  ;;  %v2279_v60 = vsel %vm2277_vm3, %v2276_v55, %v3293_v52  ;;  %v3203_v52 = vld [vmem:[%s3607_s9 + $0x8] sm:$0xff]  ;;  %v3202_v53 = vld [vmem:[%s3607_s9] sm:$0xff] }
 0x5db   : > { %v2280_v61 = vpack.c.bf16 %v2279_v60, %v2278_v57  ;;  %2503 = vmatpush.bf16.msra.mxu1 %v3207_v48  ;;  %v3302_v54 = vld [vmem:[%s4113_s29] ss:$0 sm:$0xff] }
 0x5dd   : > { %3075 = vmatmul.msk.bf16.vlgmr.msra.gmra.mxu3 %vm1651_vm5, %v2280_v61 }
 0x5df   : > { %2504 = vmatpush.bf16.msra.mxu1 %v3206_v49 }
 0x5e3   : > { %2505 = vmatpush.bf16.msra.mxu1 %v3205_v50 }
 0x5e7   : > { %2506 = vmatpush.bf16.msra.mxu1 %v3204_v51 }
 0x5eb   : > { %2507 = vmatpush.bf16.msra.mxu1 %v3203_v52 }
 0x5ef   : > { %2508 = vmatpush.bf16.msra.mxu1 %v3202_v53 }
 0x660   : > { %v2313_v0 = vpop.f32.mrf.mxu3 }
 0x661   : > { %v2314_v1 = vadd.f32 %v3299_v63, %v2313_v0 }
 0x663   : > { %v3969_v3 = vadd.f32 %v2314_v1, %v3830_v56 }
 0x665   : > { %v2322_v4 = vsel %vm1651_vm5, %v3969_v3, 0.0 }
 0x666   : > { %2323 = vadd.xlane.f32.xlu1 %v2322_v4 }
 0x668   : > { %v2315_v5 = vpop.f32.mrf.mxu3 }
 0x669   : > { %v2316_v6 = vadd.f32 %v3299_v63, %v2315_v5 }
 0x66b   : > { %v3974_v7 = vadd.f32 %v2316_v6, %v3834_v58 }
 0x66d   : > { %v2325_v8 = vsel %vm1655_vm6, %v3974_v7, 0.0 }
 0x66e   : > { %2326 = vadd.xlane.f32.xlu2 %v2325_v8 }
 0x6d9   : > { %v2324_v10 = vpop.xlane.xlu1 %2323 }
 0x6da   : > { %v2328_v62 = vmul.f32 %v2324_v10, %v3838_v2 }
 0x6dc   : > { %v2330_v56 = vsub.f32 %v3969_v3, %v2328_v62 }
 0x6de   : > { %v2332_v11 = vmul.f32 %v2330_v56, %v2330_v56 }
 0x6e0   : > { %v2334_v12 = vsel %vm1651_vm5, %v2332_v11, 0.0 }
 0x6e1   : > { %v2327_v9 = vpop.xlane.xlu2 %2326  ;;  %2335 = vadd.xlane.f32.xlu0 %v2334_v12 }
 0x6e2   : > { %v2329_v13 = vmul.f32 %v2327_v9, %v3838_v2 }
 0x6e4   : > { %v2331_v58 = vsub.f32 %v3974_v7, %v2329_v13 }
 0x6e6   : > { %v2333_v14 = vmul.f32 %v2331_v58, %v2331_v58 }
 0x6e8   : > { %v2337_v15 = vsel %vm1655_vm6, %v2333_v14, 0.0 }
 0x6e9   : > { %2338 = vadd.xlane.f32.xlu2 %v2337_v15 }
 0x754   : > { %v2336_v18 = vpop.xlane.xlu0 %2335 }
 0x755   : > { %v2340_v21 = vmul.f32 %v2336_v18, %v3838_v2 }
 0x757   : > { %v2342_v19 = vadd.f32 1e-06, %v2340_v21  ;;  %v3303_v21 = vld [vmem:[%s963_s11] ss:$0 sm:$0xff] }
 0x759   : > { %3342 = vrsqrt.f32 %v2342_v19  ;;  %vm2350_vm7 = vweird.f32 %v2342_v19 }
 0x75c   : > { %v2339_v22 = vpop.xlane.xlu2 %2338 }
 0x75d   : > { %v2341_v23 = vmul.f32 %v2339_v22, %v3838_v2 }
 0x75f   : > { %v3343_v24 = vpop.eup %3342  ;;  %v2343_v25 = vadd.f32 1e-06, %v2341_v23 }
 0x760   : > { %v2345_v26 = vmul.f32 %v3343_v24, %v2342_v19  ;;  %vm2351_vm4 = vweird.f32 %v3343_v24 }
 0x761   : > { %3344 = vrsqrt.f32 %v2343_v25  ;;  %vm2352_vm8 = vmor %vm2350_vm7, %vm2351_vm4  ;;  %vm2360_vm10 = vweird.f32 %v2343_v25 }
 0x762   : > { %v2346_v27 = vmul.f32 %v3343_v24, %v2345_v26 }
 0x764   : > { %v2347_v28 = vmul.f32 0.5, %v2346_v27 }
 0x766   : > { %v2348_v29 = vsub.f32 1.5, %v2347_v28 }
 0x767   : > { %v3345_v30 = vpop.eup %3344 }
 0x768   : > { %v2349_v31 = vmul.f32 %v3343_v24, %v2348_v29  ;;  %v2355_v32 = vmul.f32 %v3345_v30, %v2343_v25  ;;  %vm2361_vm9 = vweird.f32 %v3345_v30 }
 0x769   : > { %vm2362_vm11 = vmor %vm2360_vm10, %vm2361_vm9 }
 0x76a   : > { %v2356_v33 = vmul.f32 %v3345_v30, %v2355_v32  ;;  %v2353_v34 = vsel %vm2352_vm8, %v3343_v24, %v2349_v31 }
 0x76b   : > { %v2364_v37 = vmul.f32 %v2353_v34, %v2330_v56 }
 0x76c   : > { %v2357_v35 = vmul.f32 0.5, %v2356_v33 }
 0x76d   : > { %v2369_v40 = vmul.f32 %v3300_v17, %v2364_v37 }
 0x76e   : > { %v2358_v36 = vsub.f32 1.5, %v2357_v35 }
 0x76f   : > { %v2374_v43 = vadd.f32 %v3301_v39, %v2369_v40 }
 0x770   : > { %v2359_v20 = vmul.f32 %v3345_v30, %v2358_v36 }
 0x772   : > { %v2363_v38 = vsel %vm2362_vm11, %v3345_v30, %v2359_v20 }
 0x773   : > { %v2365_v41 = vmul.f32 %v2363_v38, %v2331_v58 }
 0x775   : > { %v2370_v42 = vmul.f32 %v3300_v17, %v2365_v41 }
 0x777   : > { %v2375_v44 = vadd.f32 %v3301_v39, %v2370_v42 }
 0x779   : > { %v2376_v45 = vpack.c.bf16 %v2375_v44, %v2374_v43 }
 0x77b   : > { %3084 = vmatmul.msk.bf16.vlgmr.msrb.gmra.mxu0 %vm1651_vm5, %v2376_v45 }
 0x7f8   : > { %v2409_v55 = vpop.f32.mrf.mxu0 }
 0x7f9   : > { %v2410_v57 = vadd.f32 %v3302_v54, %v2409_v55 }
 0x7fb   : > { %v2416_v60 = vmul.f32 0.044715, %v2410_v57  ;;  %v2414_v13 = vmul.f32 0.5, %v2410_v57 }
 0x7fd   : > { %v2418_v61 = vmul.f32 %v2416_v60, %v2410_v57 }
 0x7ff   : > { %v2420_v63 = vmul.f32 %v2418_v61, %v2410_v57 }
 0x800   : > { %v2411_v0 = vpop.f32.mrf.mxu0 }
 0x801   : > { %v2422_v1 = vadd.f32 %v2420_v63, %v2410_v57  ;;  %v2412_v4 = vadd.f32 %v3302_v54, %v2411_v0 }
 0x803   : > { %v2417_v5 = vmul.f32 0.044715, %v2412_v4  ;;  %v2424_v6 = vmul.f32 0.7978846, %v2422_v1  ;;  %v2415_v58 = vmul.f32 0.5, %v2412_v4 }
 0x805   : > { %v2419_v8 = vmul.f32 %v2417_v5, %v2412_v4  ;;  %3346 = vtanh.f32 %v2424_v6 }
 0x807   : > { %v2421_v10 = vmul.f32 %v2419_v8, %v2412_v4 }
 0x809   : > { %v2423_v62 = vadd.f32 %v2421_v10, %v2412_v4 }
 0x80b   : > { %v2425_v56 = vmul.f32 0.7978846, %v2423_v62  ;;  %v3347_v11 = vpop.eup %3346 }
 0x80c   : > { %v2428_v12 = vadd.f32 1.0, %v3347_v11 }
 0x80d   : > { %3348 = vtanh.f32 %v2425_v56 }
 0x80e   : > { %v2430_v15 = vmul.f32 %v2428_v12, %v2414_v13 }
 0x813   : > { %v3349_v9 = vpop.eup %3348 }
 0x814   : > { %v2429_v14 = vadd.f32 1.0, %v3349_v9 }
 0x816   : > { %v2431_v59 = vmul.f32 %v2429_v14, %v2415_v58 }
 0x818   : > { %v2432_v18 = vpack.c.bf16 %v2431_v59, %v2430_v15 }
 0x81a   : > { %2509 = vmatmul.bf16.vlgmr.msra.gmra.mxu1 %v2432_v18 }
 0x897   : > { %v2510_v19 = vpop.f32.mrf.mxu1 }
 0x898   : > { %v2511_v16 = vadd.f32 %v3303_v21, %v2510_v19 }
 0x89a   : > { %v2515_v22 = vadd.f32 %v2511_v16, %v3969_v3 }
 0x89c   : > { %2517 = vst.msk [vmem:[#allocation2] sm:$0xff] %vm1651_vm5, %v2515_v22 }
 0x89f   : > { %v2512_v23 = vpop.f32.mrf.mxu1 }
 0x8a0   : > { %v2513_v24 = vadd.f32 %v3303_v21, %v2512_v23  ;;  %2522 = sbr.rel (%p3117_p5) target bundleno = 2485 (0x9b5), region = 124 }
 0x8a2   : > { %v2516_v25 = vadd.f32 %v2513_v24, %v3974_v7 }
 0x8a4   : > { %2518 = vst.msk [vmem:[#allocation2 + $0x8] sm:$0x3] %vm1655_vm6, %v2516_v25 }
 0x8a5   : > { %v2524_v26 = vrot.slane %v2515_v22, 4  ;;  %vm2526_vm12 = vcmask 1040384   ;;  %v3350_v39 = vld [vmem:[%s4115_s26] ss:$0 sm:$0xff] }
 0x8a7   : > { %v2527_v27 = vsel %vm2526_vm12, %v2515_v22, %v2524_v26 }
 0x8a8   : > { %v2530_v28 = vsel %vm1655_vm6, %v2527_v27, 0.0 }
 0x8a9   : > { %2531 = vadd.xlane.f32.xlu0 %v2530_v28 }
 0x91c   : > { %v2532_v29 = vpop.xlane.xlu0 %2531 }
 0x91d   : > { %v2533_v3 = vmul.f32 %v2532_v29, %v3838_v2 }
 0x91f   : > { %v2534_v30 = vsub.f32 %v2527_v27, %v2533_v3 }
 0x921   : > { %v2535_v31 = vmul.f32 %v2534_v30, %v2534_v30 }
 0x923   : > { %v2536_v32 = vsel %vm1655_vm6, %v2535_v31, 0.0 }
 0x924   : > { %2537 = vadd.xlane.f32.xlu0 %v2536_v32 }
 0x997   : > { %v2538_v7 = vpop.xlane.xlu0 %2537 }
 0x998   : > { %v2539_v33 = vmul.f32 %v2538_v7, %v3838_v2  ;;  %v3351_v2 = vld [vmem:[%s4116_s30] ss:$0 sm:$0xff] }
 0x99a   : > { %v2540_v34 = vadd.f32 1e-06, %v2539_v33 }
 0x99c   : > { %3352 = vrsqrt.f32 %v2540_v34  ;;  %vm2547_vm13 = vweird.f32 %v2540_v34 }
 0x9a2   : > { %v3353_v35 = vpop.eup %3352 }
 0x9a3   : > { %v2542_v36 = vmul.f32 %v3353_v35, %v2540_v34  ;;  %vm2548_vm5 = vweird.f32 %v3353_v35 }
 0x9a4   : > { %vm2549_vm14 = vmor %vm2547_vm13, %vm2548_vm5 }
 0x9a5   : > { %v2543_v17 = vmul.f32 %v3353_v35, %v2542_v36 }
 0x9a7   : > { %v2544_v37 = vmul.f32 0.5, %v2543_v17 }
 0x9a9   : > { %v2545_v20 = vsub.f32 1.5, %v2544_v37 }
 0x9ab   : > { %v2546_v38 = vmul.f32 %v3353_v35, %v2545_v20 }
 0x9ad   : > { %v2550_v40 = vsel %vm2549_vm14, %v3353_v35, %v2546_v38 }
 0x9ae   : > { %v2551_v41 = vmul.f32 %v2550_v40, %v2534_v30 }
 0x9b0   : > { %v2555_v42 = vmul.f32 %v3350_v39, %v2551_v41 }
 0x9b2   : > { %v2559_v43 = vadd.f32 %v3351_v2, %v2555_v42 }
 0x9b4   : > { %2560 = vst.msk [vmem:[#allocation3] sm:$0x3] %vm1655_vm6, %v2559_v43 }
 0x9b5 PF: > { %s4117_s8 = sld [smem:[#allocation7_spill]]  ;;  %s3401_s4 = smov [#allocation3]  }
 0x9b6   : > { %s2567_s28 = sshll.u32 %s3401_s4, 4  ;;  %s4118_s6 = sld [smem:[#allocation23_spill]]  ;;  %s2568_s28 = int_to_ptr.vmem [resolvable:$true] %s2567_s28 }
 0x9bb   : > { %p3214_p6 = scmp.eq.s32.totalorder %s4117_s8, 1 }
 0x9bc   : > { %s2569_s10 = sshll.u32 %s4118_s6, 4  ;;  %s2570_s10 = int_to_ptr.hbm [resolvable:$true] %s2569_s10 }
 0x9bd   : > { %3211 = dma.vmem_to_hbm [thread:$0]  (%p3214_p6), %s2568_s28, 32, %s2570_s10, [#allocation4]  }
 0x9be   : > { %3387 = dma.done.wait (%p3214_p6), [#allocation4], 32  }
 0x9bf   : > { %3389 = vsyncadd (%p3214_p6), [#allocation4], 4294967264 }
 0x9c0 PF: > { %s4119_s14 = sld [smem:[#allocation6_spill]] }
 0x9c6   : > { %s35_s5 = sadd.s32 1, %s4119_s14  }
 0x9c7   : > { %p32_p7 = scmp.ge.s32.totalorder %s35_s5, 4  }
 0x9c9   :  { %34 = sbr.rel (!%p32_p7) target bundleno = 18 (0x12), region = 196 }
 0x9ce   :  { %2583 = vsyncpa [#allocation4], 1 }
 0x9cf   :  { %2585 = vsyncpa [#allocation4 + $0x1], 1 }

</bundles_post_ra>
